<compile_context>
chip_gen: v6e
topology: v6e:2x2x1
jax: 0.10.0
libtpu: 0.0.40
codegen_flags: <defaults>
</compile_context>

<pallas_src>
import jax
import jax.numpy as jnp
import numpy as np
from jax import lax
from jax.experimental import pallas as pl
from jax.experimental.pallas import tpu as pltpu

UNROLL = 8          # time-loop unroll factor == sublane tile height for y stores
LANE = 128          # lane width; H is padded to a multiple of this
DEF_TARGET_TS = 256 # target sequence tile


def _round_up(x, m):
    return ((x + m - 1) // m) * m


# ---------------------------------------------------------------------------
# Fused projection + recurrence kernel (one grid axis over S-blocks)
# ---------------------------------------------------------------------------
def _make_kernel(ts, Hp, last_local):
    num_sub = ts // UNROLL

    def kernel(x_ref, wih_ref, whh_ref, b_ref, bhn_ref, h0_ref,
               y_ref, hn_ref, h_sc, gx_sc, y_sc):
        blk = pl.program_id(0)

        @pl.when(blk == 0)
        def _init():
            h_sc[...] = h0_ref[...].astype(jnp.float32)

        # Fused input projection for this block: one (ts, I) x (I, 3*Hp) MXU pass.
        # b_ref already contains b_ih (+ b_hh for the r/z gates).
        gx_sc[...] = (jnp.dot(x_ref[...], wih_ref[...],
                              preferred_element_type=jnp.float32)
                      + b_ref[...].astype(jnp.float32))

        whh = whh_ref[...]                        # (Hp, 3*Hp) fused recurrent weights
        wdt = whh.dtype
        bhn = bhn_ref[...].astype(jnp.float32)    # (1, Hp)

        def sub_block(sb, h):
            base = pl.multiple_of(sb * UNROLL, UNROLL)
            # One hoisted (UNROLL, 3*Hp) load; rows extracted with static indices.
            gx = gx_sc[pl.ds(base, UNROLL), :]
            for u in range(UNROLL):               # manual 8-way unroll
                row = gx[u:u + 1, :]              # (1, 3*Hp), static sublane slice
                gr = row[:, 0:Hp]
                gz = row[:, Hp:2 * Hp]
                gn = row[:, 2 * Hp:3 * Hp]
                # Single fused recurrent matmul per step (one MXU push, 3*Hp lanes).
                gh = jnp.dot(h.astype(wdt), whh, preferred_element_type=jnp.float32)
                r = jax.nn.sigmoid(gr + gh[:, 0:Hp])
                z = jax.nn.sigmoid(gz + gh[:, Hp:2 * Hp])
                n = jnp.tanh(gn + r * (gh[:, 2 * Hp:3 * Hp] + bhn))
                h = (1.0 - z) * n + z * h
                y_sc[pl.ds(u, 1), :] = h          # static row store into staging scratch
            # One lane/sublane-dense (UNROLL, Hp) tile store per sub-block.
            y_ref[pl.ds(base, UNROLL), :] = y_sc[...].astype(y_ref.dtype)
            return h

        h_fin = lax.fori_loop(0, num_sub, sub_block, h_sc[...])
        h_sc[...] = h_fin                         # carry hidden state to next grid step

        @pl.when(blk == pl.num_programs(0) - 1)
        def _final():
            # h_n == y row of the last *true* timestep; padded tail rows are discarded
            # by the wrapper, so no per-step tail masking is needed anywhere.
            hn_ref[...] = y_ref[pl.ds(last_local, 1), :].astype(hn_ref.dtype)

    return kernel


# ---------------------------------------------------------------------------
# Wrapper (functional equivalent of GRULocal.forward; returns (y, h_n))
# ---------------------------------------------------------------------------
def gru_local_forward(x, params, h0, *, compute_dtype=jnp.float32,
                      target_ts=DEF_TARGET_TS):
    """x: (S, I); params: PyTorch-shaped (w_ih (3H,I), w_hh (3H,H), b_ih (3H,), b_hh (3H,));
    h0: (num_layers=1, H).  Returns (y (S, H), h_n (1, H))."""
    w_ih, w_hh, b_ih, b_hh = params
    S, I = x.shape
    if h0.shape[0] != 1:
        # TODO(synk): num_layers > 1 would need stacked GRU cells; module default is 1.
        raise NotImplementedError("only num_layers == 1 is supported")
    H = h0.shape[1]
    Hp = _round_up(H, LANE)

    # PyTorch gate order r, z, n; transpose for x @ W^T layout; pad each gate to Hp
    # lanes so per-gate slices of the fused (.., 3*Hp) products are lane-aligned.
    def pad_cols(w):            # (.., H) -> (.., Hp)
        return jnp.pad(w, ((0, 0), (0, Hp - H)))

    wih_cat = jnp.concatenate(
        [pad_cols(w_ih[g * H:(g + 1) * H].T) for g in range(3)], axis=1)          # (I, 3Hp)
    whh_cat = jnp.concatenate(
        [jnp.pad(w_hh[g * H:(g + 1) * H].T, ((0, Hp - H), (0, Hp - H)))
         for g in range(3)], axis=1)                                               # (Hp, 3Hp)

    def pad_vec(v):
        return jnp.pad(v.reshape(1, H), ((0, 0), (0, Hp - H)))

    # Fold b_hh's r/z parts into the projection bias; b_hn stays in the recurrence.
    b_cat = jnp.concatenate([pad_vec(b_ih[0:H] + b_hh[0:H]),
                             pad_vec(b_ih[H:2 * H] + b_hh[H:2 * H]),
                             pad_vec(b_ih[2 * H:3 * H])], axis=1).astype(jnp.float32)
    bhn = pad_vec(b_hh[2 * H:3 * H]).astype(jnp.float32)                            # (1, Hp)
    h0p = jnp.pad(h0.astype(jnp.float32), ((0, 0), (0, Hp - H)))                    # (1, Hp)

    cdt = compute_dtype
    x_c = x.astype(cdt)
    wih_cat = wih_cat.astype(cdt)
    whh_cat = whh_cat.astype(cdt)
    isz = jnp.dtype(cdt).itemsize

    # --- sequence tiling: fixed target, pad S up to a multiple of ts ----------------
    nblk = max(1, -(-S // target_ts))
    ts = _round_up(-(-S // nblk), UNROLL)

    def vmem_est(ts_):
        return (2 * ts_ * I * isz                 # x block (double-buffered)
                + 2 * I * 3 * Hp * isz            # W_ih (counted double-buffered)
                + 2 * Hp * 3 * Hp * isz           # W_hh (counted double-buffered)
                + 2 * ts_ * Hp * 4                # y block (double-buffered)
                + ts_ * 3 * Hp * 4                # gx scratch
                + (UNROLL + 8) * Hp * 4)          # staging / h / biases / h_n

    budget = 40 << 20                             # safe inside v7x's 64 MiB VMEM
    while vmem_est(ts) > budget and ts > UNROLL:
        ts = max(UNROLL, _round_up(ts // 2, UNROLL))

    nblk = -(-S // ts)
    s_pad = nblk * ts
    if s_pad != S:
        x_c = jnp.pad(x_c, ((0, s_pad - S), (0, 0)))
    last_local = (S - 1) - (nblk - 1) * ts        # h_n row inside the last block

    kernel = _make_kernel(ts, Hp, last_local)
    y_pad, h_n = pl.pallas_call(
        kernel,
        out_shape=(jax.ShapeDtypeStruct((s_pad, Hp), jnp.float32),
                   jax.ShapeDtypeStruct((1, Hp), jnp.float32)),
        grid_spec=pltpu.PrefetchScalarGridSpec(
            num_scalar_prefetch=0,
            grid=(nblk,),
            in_specs=[
                pl.BlockSpec((ts, I), lambda i: (i, 0)),        # x block (streamed)
                pl.BlockSpec((I, 3 * Hp), lambda i: (0, 0)),    # fused W_ih^T
                pl.BlockSpec((Hp, 3 * Hp), lambda i: (0, 0)),   # fused W_hh^T
                pl.BlockSpec((1, 3 * Hp), lambda i: (0, 0)),    # folded projection bias
                pl.BlockSpec((1, Hp), lambda i: (0, 0)),        # b_hn
                pl.BlockSpec((1, Hp), lambda i: (0, 0)),        # h0
            ],
            out_specs=(
                pl.BlockSpec((ts, Hp), lambda i: (i, 0)),       # y block
                pl.BlockSpec((1, Hp), lambda i: (0, 0)),        # h_n
            ),
            scratch_shapes=[
                pltpu.VMEM((1, Hp), jnp.float32),               # carried hidden state
                pltpu.VMEM((ts, 3 * Hp), jnp.float32),          # per-block gx
                pltpu.VMEM((UNROLL, Hp), jnp.float32),          # y row staging
            ],
        ),
        compiler_params=pltpu.CompilerParams(
            dimension_semantics=("arbitrary",),                 # serial recurrence
            vmem_limit_bytes=int(min(max(2 * vmem_est(ts) + (4 << 20), 16 << 20),
                                     56 << 20)),
        ),
    )(x_c, wih_cat, whh_cat, b_cat, bhn, h0p)

    # TODO(synk): GRULocal.with_hidden statefully updates self.hidden; in JAX the
    # caller threads h_n back in as the next h0 (functional state).
    return y_pad[:S, :H], h_n[:, :H]


# ---------------------------------------------------------------------------
# Deterministic init matching PyTorch nn.GRU parameter shapes / gate order.
# ---------------------------------------------------------------------------
def init_gru_params(key, input_size, hidden_size):
    k1, k2, k3, k4 = jax.random.split(key, 4)
    bound = 1.0 / np.sqrt(hidden_size)
    w_ih = jax.random.uniform(k1, (3 * hidden_size, input_size), jnp.float32, -bound, bound)
    w_hh = jax.random.uniform(k2, (3 * hidden_size, hidden_size), jnp.float32, -bound, bound)
    b_ih = jax.random.uniform(k3, (3 * hidden_size,), jnp.float32, -bound, bound)
    b_hh = jax.random.uniform(k4, (3 * hidden_size,), jnp.float32, -bound, bound)
    return (w_ih, w_hh, b_ih, b_hh)


def gru_reference(x, params, h0):
    """Pure-JAX reference of the PyTorch GRU recurrence (f32)."""
    w_ih, w_hh, b_ih, b_hh = [p.astype(jnp.float32) for p in params]
    H = h0.shape[1]
    wih_t, whh_t = w_ih.T, w_hh.T

    def step(h, x_t):
        gx = x_t[None, :] @ wih_t + b_ih[None, :]
        gh = h @ whh_t + b_hh[None, :]
        r = jax.nn.sigmoid(gx[:, 0:H] + gh[:, 0:H])
        z = jax.nn.sigmoid(gx[:, H:2 * H] + gh[:, H:2 * H])
        n = jnp.tanh(gx[:, 2 * H:3 * H] + r * gh[:, 2 * H:3 * H])
        h_new = (1.0 - z) * n + z * h
        return h_new, h_new[0]

    h_n, ys = lax.scan(step, h0.astype(jnp.float32), x.astype(jnp.float32))
    return ys, h_n


if __name__ == "__main__":
    seq_len, input_size, hidden_size, num_layers = 8, 16, 32, 1

    key = jax.random.PRNGKey(0)
    k_x, k_p, k_x2, k_x3 = jax.random.split(key, 4)
    x = jax.random.normal(k_x, (seq_len, input_size), jnp.float32)
    params = init_gru_params(k_p, input_size, hidden_size)
    h0 = jnp.zeros((num_layers, hidden_size), jnp.float32)   # self.hidden

    # f32 path (tight check against pure-JAX reference)
    y, h_n = gru_local_forward(x, params, h0)
    jax.block_until_ready((y, h_n))
    y_ref, h_ref = gru_reference(x, params, h0)
    np.testing.assert_allclose(np.asarray(y), np.asarray(y_ref), rtol=1e-5, atol=1e-5)
    np.testing.assert_allclose(np.asarray(h_n), np.asarray(h_ref), rtol=1e-5, atol=1e-5)

    # Ragged sequence length (exercises tail padding + h_n capture at the true last step)
    x2 = jax.random.normal(k_x2, (12, input_size), jnp.float32)
    y2, h_n2 = gru_local_forward(x2, params, h0)
    jax.block_until_ready((y2, h_n2))
    y2_ref, h2_ref = gru_reference(x2, params, h0)
    np.testing.assert_allclose(np.asarray(y2), np.asarray(y2_ref), rtol=1e-5, atol=1e-5)
    np.testing.assert_allclose(np.asarray(h_n2), np.asarray(h2_ref), rtol=1e-5, atol=1e-5)

    # Multi-block grid (small target tile -> 3 blocks; exercises the VMEM-carried h)
    x3 = jax.random.normal(k_x3, (40, input_size), jnp.float32)
    y3, h_n3 = gru_local_forward(x3, params, h0, target_ts=16)
    jax.block_until_ready((y3, h_n3))
    y3_ref, h3_ref = gru_reference(x3, params, h0)
    np.testing.assert_allclose(np.asarray(y3), np.asarray(y3_ref), rtol=1e-5, atol=1e-5)
    np.testing.assert_allclose(np.asarray(h_n3), np.asarray(h3_ref), rtol=1e-5, atol=1e-5)

    # bf16 matmul-operand path (v6e/v7x MXU-native), f32 accumulate + f32 gate math.
    # Note: h is re-cast to bf16 each step before the recurrent matmul; rounding
    # accumulates over very long sequences (acceptable at this tolerance).
    y_bf, h_bf = gru_local_forward(x, params, h0, compute_dtype=jnp.bfloat16)
    jax.block_until_ready((y_bf, h_bf))
    np.testing.assert_allclose(np.asarray(y_bf), np.asarray(y_ref), rtol=5e-2, atol=5e-2)
    np.testing.assert_allclose(np.asarray(h_bf), np.asarray(h_ref), rtol=5e-2, atol=5e-2)

    print("KERNEL_OK")
</pallas_src>

<mosaic_0001>
module attributes {stable_mosaic.version = 11 : i64} {
  func.func @kernel(%arg0: i32, %arg1: memref<8x16xf32, #tpu.memory_space<vmem>>, %arg2: memref<16x384xf32, #tpu.memory_space<vmem>>, %arg3: memref<128x384xf32, #tpu.memory_space<vmem>>, %arg4: memref<1x384xf32, #tpu.memory_space<vmem>>, %arg5: memref<1x128xf32, #tpu.memory_space<vmem>>, %arg6: memref<1x128xf32, #tpu.memory_space<vmem>>, %arg7: memref<8x128xf32, #tpu.memory_space<vmem>>, %arg8: memref<1x128xf32, #tpu.memory_space<vmem>>, %arg9: memref<1x128xf32, #tpu.memory_space<vmem>>, %arg10: memref<8x384xf32, #tpu.memory_space<vmem>>, %arg11: memref<8x128xf32, #tpu.memory_space<vmem>>) attributes {dimension_semantics = [#tpu.dimension_semantics<arbitrary>], iteration_bounds = array<i64: 1>, scalar_prefetch = 0 : i64, scratch_operands = 3 : i64, tpu.core_type = #tpu.core_type<tc>, window_params = [{transform_indices = @transform_0, window_bounds = array<i64: 8, 16>}, {pipeline_mode = #tpu.pipeline_mode<synchronous>, transform_indices = @transform_1, window_bounds = array<i64: 16, 384>}, {pipeline_mode = #tpu.pipeline_mode<synchronous>, transform_indices = @transform_2, window_bounds = array<i64: 128, 384>}, {pipeline_mode = #tpu.pipeline_mode<synchronous>, transform_indices = @transform_3, window_bounds = array<i64: 1, 384>}, {pipeline_mode = #tpu.pipeline_mode<synchronous>, transform_indices = @transform_4, window_bounds = array<i64: 1, 128>}, {pipeline_mode = #tpu.pipeline_mode<synchronous>, transform_indices = @transform_5, window_bounds = array<i64: 1, 128>}, {transform_indices = @transform_6, window_bounds = array<i64: 8, 128>}, {pipeline_mode = #tpu.pipeline_mode<synchronous>, transform_indices = @transform_7, window_bounds = array<i64: 1, 128>}]} {
    %c0_i32 = arith.constant 0 : i32
    %0 = arith.cmpi eq, %arg0, %c0_i32 : i32
    %1 = arith.extui %0 : i1 to i32
    %c0_i32_0 = arith.constant 0 : i32
    %2 = arith.cmpi ne, %1, %c0_i32_0 : i32
    scf.if %2 {
      %c0_64 = arith.constant 0 : index
      %c0_65 = arith.constant 0 : index
      %264 = vector.load %arg6[%c0_64, %c0_65] : memref<1x128xf32, #tpu.memory_space<vmem>>, vector<1x128xf32>
      %c0_66 = arith.constant 0 : index
      %c0_67 = arith.constant 0 : index
      %265 = vector.load %arg9[%c0_66, %c0_67] : memref<1x128xf32, #tpu.memory_space<vmem>>, vector<1x128xf32>
      tpu.vector_store %arg9[%c0_66, %c0_67], %264 {strides = array<i32>} : memref<1x128xf32, #tpu.memory_space<vmem>>, vector<1x128xf32>,
    } else {
    }
    %c0 = arith.constant 0 : index
    %c0_1 = arith.constant 0 : index
    %3 = vector.load %arg1[%c0, %c0_1] : memref<8x16xf32, #tpu.memory_space<vmem>>, vector<8x16xf32>
    %c0_2 = arith.constant 0 : index
    %c0_3 = arith.constant 0 : index
    %4 = vector.load %arg2[%c0_2, %c0_3] : memref<16x384xf32, #tpu.memory_space<vmem>>, vector<16x384xf32>
    %cst = arith.constant dense<0.000000e+00> : vector<8x384xf32>
    %5 = tpu.matmul %3, %4, %cst {dimension_numbers = #tpu.dot_dimension_numbers<[1], [0], [0], [1], [0, 0, 1, 1], [], []>} : vector<8x16xf32>, vector<16x384xf32>, vector<8x384xf32> -> vector<8x384xf32>
    %c0_4 = arith.constant 0 : index
    %c0_5 = arith.constant 0 : index
    %6 = vector.load %arg4[%c0_4, %c0_5] : memref<1x384xf32, #tpu.memory_space<vmem>>, vector<1x384xf32>
    %7 = vector.broadcast %6 : vector<1x384xf32> to vector<8x384xf32>
    %8 = arith.addf %5, %7 : vector<8x384xf32>
    %c0_6 = arith.constant 0 : index
    %c0_7 = arith.constant 0 : index
    %9 = vector.load %arg10[%c0_6, %c0_7] : memref<8x384xf32, #tpu.memory_space<vmem>>, vector<8x384xf32>
    tpu.vector_store %arg10[%c0_6, %c0_7], %8 {strides = array<i32>} : memref<8x384xf32, #tpu.memory_space<vmem>>, vector<8x384xf32>,
    %c0_8 = arith.constant 0 : index
    %c0_9 = arith.constant 0 : index
    %10 = vector.load %arg3[%c0_8, %c0_9] : memref<128x384xf32, #tpu.memory_space<vmem>>, vector<128x384xf32>
    %c0_10 = arith.constant 0 : index
    %c0_11 = arith.constant 0 : index
    %11 = vector.load %arg5[%c0_10, %c0_11] : memref<1x128xf32, #tpu.memory_space<vmem>>, vector<1x128xf32>
    %c0_12 = arith.constant 0 : index
    %c0_13 = arith.constant 0 : index
    %12 = vector.load %arg9[%c0_12, %c0_13] : memref<1x128xf32, #tpu.memory_space<vmem>>, vector<1x128xf32>
    %c0_i32_14 = arith.constant 0 : i32
    %c8_i32 = arith.constant 8 : i32
    %13 = arith.muli %c0_i32_14, %c8_i32 : i32
    %14 = tpu.assume_multiple %13, 8 : i32
    %15 = arith.index_cast %14 : i32 to index
    %c0_15 = arith.constant 0 : index
    %16 = vector.load %arg10[%15, %c0_15] : memref<8x384xf32, #tpu.memory_space<vmem>>, vector<8x384xf32>
    %17 = vector.extract_strided_slice %16 {offsets = [0, 0], sizes = [1, 384], strides = [1, 1]} : vector<8x384xf32> to vector<1x384xf32>
    %18 = vector.extract_strided_slice %17 {offsets = [0, 0], sizes = [1, 128], strides = [1, 1]} : vector<1x384xf32> to vector<1x128xf32>
    %19 = vector.extract_strided_slice %17 {offsets = [0, 128], sizes = [1, 128], strides = [1, 1]} : vector<1x384xf32> to vector<1x128xf32>
    %20 = vector.extract_strided_slice %17 {offsets = [0, 256], sizes = [1, 128], strides = [1, 1]} : vector<1x384xf32> to vector<1x128xf32>
    %cst_16 = arith.constant dense<0.000000e+00> : vector<1x384xf32>
    %21 = tpu.matmul %12, %10, %cst_16 {dimension_numbers = #tpu.dot_dimension_numbers<[1], [0], [0], [1], [0, 0, 1, 1], [], []>} : vector<1x128xf32>, vector<128x384xf32>, vector<1x384xf32> -> vector<1x384xf32>
    %22 = vector.extract_strided_slice %21 {offsets = [0, 0], sizes = [1, 128], strides = [1, 1]} : vector<1x384xf32> to vector<1x128xf32>
    %23 = arith.addf %18, %22 : vector<1x128xf32>
    %24 = arith.negf %23 : vector<1x128xf32>
    %25 = math.exp %24 : vector<1x128xf32>
    %cst_17 = arith.constant 1.000000e+00 : f32
    %26 = vector.broadcast %cst_17 : f32 to vector<1x128xf32>
    %27 = arith.addf %26, %25 : vector<1x128xf32>
    %28 = arith.divf %26, %27 : vector<1x128xf32>
    %29 = vector.extract_strided_slice %21 {offsets = [0, 128], sizes = [1, 128], strides = [1, 1]} : vector<1x384xf32> to vector<1x128xf32>
    %30 = arith.addf %19, %29 : vector<1x128xf32>
    %31 = arith.negf %30 : vector<1x128xf32>
    %32 = math.exp %31 : vector<1x128xf32>
    %cst_18 = arith.constant 1.000000e+00 : f32
    %33 = vector.broadcast %cst_18 : f32 to vector<1x128xf32>
    %34 = arith.addf %33, %32 : vector<1x128xf32>
    %35 = arith.divf %33, %34 : vector<1x128xf32>
    %36 = vector.extract_strided_slice %21 {offsets = [0, 256], sizes = [1, 128], strides = [1, 1]} : vector<1x384xf32> to vector<1x128xf32>
    %37 = arith.addf %36, %11 : vector<1x128xf32>
    %38 = arith.mulf %28, %37 : vector<1x128xf32>
    %39 = arith.addf %20, %38 : vector<1x128xf32>
    %40 = math.tanh %39 : vector<1x128xf32>
    %cst_19 = arith.constant 1.000000e+00 : f32
    %41 = vector.broadcast %cst_19 : f32 to vector<1x128xf32>
    %42 = arith.subf %41, %35 : vector<1x128xf32>
    %43 = arith.mulf %42, %40 : vector<1x128xf32>
    %44 = arith.mulf %35, %12 : vector<1x128xf32>
    %45 = arith.addf %43, %44 : vector<1x128xf32>
    %c0_20 = arith.constant 0 : index
    %c0_21 = arith.constant 0 : index
    %46 = vector.load %arg11[%c0_20, %c0_21] : memref<8x128xf32, #tpu.memory_space<vmem>>, vector<1x128xf32>
    tpu.vector_store %arg11[%c0_20, %c0_21], %45 {strides = array<i32>} : memref<8x128xf32, #tpu.memory_space<vmem>>, vector<1x128xf32>,
    %47 = vector.extract_strided_slice %16 {offsets = [1, 0], sizes = [1, 384], strides = [1, 1]} : vector<8x384xf32> to vector<1x384xf32>
    %48 = vector.extract_strided_slice %47 {offsets = [0, 0], sizes = [1, 128], strides = [1, 1]} : vector<1x384xf32> to vector<1x128xf32>
    %49 = vector.extract_strided_slice %47 {offsets = [0, 128], sizes = [1, 128], strides = [1, 1]} : vector<1x384xf32> to vector<1x128xf32>
    %50 = vector.extract_strided_slice %47 {offsets = [0, 256], sizes = [1, 128], strides = [1, 1]} : vector<1x384xf32> to vector<1x128xf32>
    %cst_22 = arith.constant dense<0.000000e+00> : vector<1x384xf32>
    %51 = tpu.matmul %45, %10, %cst_22 {dimension_numbers = #tpu.dot_dimension_numbers<[1], [0], [0], [1], [0, 0, 1, 1], [], []>} : vector<1x128xf32>, vector<128x384xf32>, vector<1x384xf32> -> vector<1x384xf32>
    %52 = vector.extract_strided_slice %51 {offsets = [0, 0], sizes = [1, 128], strides = [1, 1]} : vector<1x384xf32> to vector<1x128xf32>
    %53 = arith.addf %48, %52 : vector<1x128xf32>
    %54 = arith.negf %53 : vector<1x128xf32>
    %55 = math.exp %54 : vector<1x128xf32>
    %cst_23 = arith.constant 1.000000e+00 : f32
    %56 = vector.broadcast %cst_23 : f32 to vector<1x128xf32>
    %57 = arith.addf %56, %55 : vector<1x128xf32>
    %58 = arith.divf %56, %57 : vector<1x128xf32>
    %59 = vector.extract_strided_slice %51 {offsets = [0, 128], sizes = [1, 128], strides = [1, 1]} : vector<1x384xf32> to vector<1x128xf32>
    %60 = arith.addf %49, %59 : vector<1x128xf32>
    %61 = arith.negf %60 : vector<1x128xf32>
    %62 = math.exp %61 : vector<1x128xf32>
    %cst_24 = arith.constant 1.000000e+00 : f32
    %63 = vector.broadcast %cst_24 : f32 to vector<1x128xf32>
    %64 = arith.addf %63, %62 : vector<1x128xf32>
    %65 = arith.divf %63, %64 : vector<1x128xf32>
    %66 = vector.extract_strided_slice %51 {offsets = [0, 256], sizes = [1, 128], strides = [1, 1]} : vector<1x384xf32> to vector<1x128xf32>
    %67 = arith.addf %66, %11 : vector<1x128xf32>
    %68 = arith.mulf %58, %67 : vector<1x128xf32>
    %69 = arith.addf %50, %68 : vector<1x128xf32>
    %70 = math.tanh %69 : vector<1x128xf32>
    %cst_25 = arith.constant 1.000000e+00 : f32
    %71 = vector.broadcast %cst_25 : f32 to vector<1x128xf32>
    %72 = arith.subf %71, %65 : vector<1x128xf32>
    %73 = arith.mulf %72, %70 : vector<1x128xf32>
    %74 = arith.mulf %65, %45 : vector<1x128xf32>
    %75 = arith.addf %73, %74 : vector<1x128xf32>
    %c1 = arith.constant 1 : index
    %c0_26 = arith.constant 0 : index
    %76 = vector.load %arg11[%c1, %c0_26] : memref<8x128xf32, #tpu.memory_space<vmem>>, vector<1x128xf32>
    tpu.vector_store %arg11[%c1, %c0_26], %75 {strides = array<i32>} : memref<8x128xf32, #tpu.memory_space<vmem>>, vector<1x128xf32>,
    %77 = vector.extract_strided_slice %16 {offsets = [2, 0], sizes = [1, 384], strides = [1, 1]} : vector<8x384xf32> to vector<1x384xf32>
    %78 = vector.extract_strided_slice %77 {offsets = [0, 0], sizes = [1, 128], strides = [1, 1]} : vector<1x384xf32> to vector<1x128xf32>
    %79 = vector.extract_strided_slice %77 {offsets = [0, 128], sizes = [1, 128], strides = [1, 1]} : vector<1x384xf32> to vector<1x128xf32>
    %80 = vector.extract_strided_slice %77 {offsets = [0, 256], sizes = [1, 128], strides = [1, 1]} : vector<1x384xf32> to vector<1x128xf32>
    %cst_27 = arith.constant dense<0.000000e+00> : vector<1x384xf32>
    %81 = tpu.matmul %75, %10, %cst_27 {dimension_numbers = #tpu.dot_dimension_numbers<[1], [0], [0], [1], [0, 0, 1, 1], [], []>} : vector<1x128xf32>, vector<128x384xf32>, vector<1x384xf32> -> vector<1x384xf32>
    %82 = vector.extract_strided_slice %81 {offsets = [0, 0], sizes = [1, 128], strides = [1, 1]} : vector<1x384xf32> to vector<1x128xf32>
    %83 = arith.addf %78, %82 : vector<1x128xf32>
    %84 = arith.negf %83 : vector<1x128xf32>
    %85 = math.exp %84 : vector<1x128xf32>
    %cst_28 = arith.constant 1.000000e+00 : f32
    %86 = vector.broadcast %cst_28 : f32 to vector<1x128xf32>
    %87 = arith.addf %86, %85 : vector<1x128xf32>
    %88 = arith.divf %86, %87 : vector<1x128xf32>
    %89 = vector.extract_strided_slice %81 {offsets = [0, 128], sizes = [1, 128], strides = [1, 1]} : vector<1x384xf32> to vector<1x128xf32>
    %90 = arith.addf %79, %89 : vector<1x128xf32>
    %91 = arith.negf %90 : vector<1x128xf32>
    %92 = math.exp %91 : vector<1x128xf32>
    %cst_29 = arith.constant 1.000000e+00 : f32
    %93 = vector.broadcast %cst_29 : f32 to vector<1x128xf32>
    %94 = arith.addf %93, %92 : vector<1x128xf32>
    %95 = arith.divf %93, %94 : vector<1x128xf32>
    %96 = vector.extract_strided_slice %81 {offsets = [0, 256], sizes = [1, 128], strides = [1, 1]} : vector<1x384xf32> to vector<1x128xf32>
    %97 = arith.addf %96, %11 : vector<1x128xf32>
    %98 = arith.mulf %88, %97 : vector<1x128xf32>
    %99 = arith.addf %80, %98 : vector<1x128xf32>
    %100 = math.tanh %99 : vector<1x128xf32>
    %cst_30 = arith.constant 1.000000e+00 : f32
    %101 = vector.broadcast %cst_30 : f32 to vector<1x128xf32>
    %102 = arith.subf %101, %95 : vector<1x128xf32>
    %103 = arith.mulf %102, %100 : vector<1x128xf32>
    %104 = arith.mulf %95, %75 : vector<1x128xf32>
    %105 = arith.addf %103, %104 : vector<1x128xf32>
    %c2 = arith.constant 2 : index
    %c0_31 = arith.constant 0 : index
    %106 = vector.load %arg11[%c2, %c0_31] : memref<8x128xf32, #tpu.memory_space<vmem>>, vector<1x128xf32>
    tpu.vector_store %arg11[%c2, %c0_31], %105 {strides = array<i32>} : memref<8x128xf32, #tpu.memory_space<vmem>>, vector<1x128xf32>,
    %107 = vector.extract_strided_slice %16 {offsets = [3, 0], sizes = [1, 384], strides = [1, 1]} : vector<8x384xf32> to vector<1x384xf32>
    %108 = vector.extract_strided_slice %107 {offsets = [0, 0], sizes = [1, 128], strides = [1, 1]} : vector<1x384xf32> to vector<1x128xf32>
    %109 = vector.extract_strided_slice %107 {offsets = [0, 128], sizes = [1, 128], strides = [1, 1]} : vector<1x384xf32> to vector<1x128xf32>
    %110 = vector.extract_strided_slice %107 {offsets = [0, 256], sizes = [1, 128], strides = [1, 1]} : vector<1x384xf32> to vector<1x128xf32>
    %cst_32 = arith.constant dense<0.000000e+00> : vector<1x384xf32>
    %111 = tpu.matmul %105, %10, %cst_32 {dimension_numbers = #tpu.dot_dimension_numbers<[1], [0], [0], [1], [0, 0, 1, 1], [], []>} : vector<1x128xf32>, vector<128x384xf32>, vector<1x384xf32> -> vector<1x384xf32>
    %112 = vector.extract_strided_slice %111 {offsets = [0, 0], sizes = [1, 128], strides = [1, 1]} : vector<1x384xf32> to vector<1x128xf32>
    %113 = arith.addf %108, %112 : vector<1x128xf32>
    %114 = arith.negf %113 : vector<1x128xf32>
    %115 = math.exp %114 : vector<1x128xf32>
    %cst_33 = arith.constant 1.000000e+00 : f32
    %116 = vector.broadcast %cst_33 : f32 to vector<1x128xf32>
    %117 = arith.addf %116, %115 : vector<1x128xf32>
    %118 = arith.divf %116, %117 : vector<1x128xf32>
    %119 = vector.extract_strided_slice %111 {offsets = [0, 128], sizes = [1, 128], strides = [1, 1]} : vector<1x384xf32> to vector<1x128xf32>
    %120 = arith.addf %109, %119 : vector<1x128xf32>
    %121 = arith.negf %120 : vector<1x128xf32>
    %122 = math.exp %121 : vector<1x128xf32>
    %cst_34 = arith.constant 1.000000e+00 : f32
    %123 = vector.broadcast %cst_34 : f32 to vector<1x128xf32>
    %124 = arith.addf %123, %122 : vector<1x128xf32>
    %125 = arith.divf %123, %124 : vector<1x128xf32>
    %126 = vector.extract_strided_slice %111 {offsets = [0, 256], sizes = [1, 128], strides = [1, 1]} : vector<1x384xf32> to vector<1x128xf32>
    %127 = arith.addf %126, %11 : vector<1x128xf32>
    %128 = arith.mulf %118, %127 : vector<1x128xf32>
    %129 = arith.addf %110, %128 : vector<1x128xf32>
    %130 = math.tanh %129 : vector<1x128xf32>
    %cst_35 = arith.constant 1.000000e+00 : f32
    %131 = vector.broadcast %cst_35 : f32 to vector<1x128xf32>
    %132 = arith.subf %131, %125 : vector<1x128xf32>
    %133 = arith.mulf %132, %130 : vector<1x128xf32>
    %134 = arith.mulf %125, %105 : vector<1x128xf32>
    %135 = arith.addf %133, %134 : vector<1x128xf32>
    %c3 = arith.constant 3 : index
    %c0_36 = arith.constant 0 : index
    %136 = vector.load %arg11[%c3, %c0_36] : memref<8x128xf32, #tpu.memory_space<vmem>>, vector<1x128xf32>
    tpu.vector_store %arg11[%c3, %c0_36], %135 {strides = array<i32>} : memref<8x128xf32, #tpu.memory_space<vmem>>, vector<1x128xf32>,
    %137 = vector.extract_strided_slice %16 {offsets = [4, 0], sizes = [1, 384], strides = [1, 1]} : vector<8x384xf32> to vector<1x384xf32>
    %138 = vector.extract_strided_slice %137 {offsets = [0, 0], sizes = [1, 128], strides = [1, 1]} : vector<1x384xf32> to vector<1x128xf32>
    %139 = vector.extract_strided_slice %137 {offsets = [0, 128], sizes = [1, 128], strides = [1, 1]} : vector<1x384xf32> to vector<1x128xf32>
    %140 = vector.extract_strided_slice %137 {offsets = [0, 256], sizes = [1, 128], strides = [1, 1]} : vector<1x384xf32> to vector<1x128xf32>
    %cst_37 = arith.constant dense<0.000000e+00> : vector<1x384xf32>
    %141 = tpu.matmul %135, %10, %cst_37 {dimension_numbers = #tpu.dot_dimension_numbers<[1], [0], [0], [1], [0, 0, 1, 1], [], []>} : vector<1x128xf32>, vector<128x384xf32>, vector<1x384xf32> -> vector<1x384xf32>
    %142 = vector.extract_strided_slice %141 {offsets = [0, 0], sizes = [1, 128], strides = [1, 1]} : vector<1x384xf32> to vector<1x128xf32>
    %143 = arith.addf %138, %142 : vector<1x128xf32>
    %144 = arith.negf %143 : vector<1x128xf32>
    %145 = math.exp %144 : vector<1x128xf32>
    %cst_38 = arith.constant 1.000000e+00 : f32
    %146 = vector.broadcast %cst_38 : f32 to vector<1x128xf32>
    %147 = arith.addf %146, %145 : vector<1x128xf32>
    %148 = arith.divf %146, %147 : vector<1x128xf32>
    %149 = vector.extract_strided_slice %141 {offsets = [0, 128], sizes = [1, 128], strides = [1, 1]} : vector<1x384xf32> to vector<1x128xf32>
    %150 = arith.addf %139, %149 : vector<1x128xf32>
    %151 = arith.negf %150 : vector<1x128xf32>
    %152 = math.exp %151 : vector<1x128xf32>
    %cst_39 = arith.constant 1.000000e+00 : f32
    %153 = vector.broadcast %cst_39 : f32 to vector<1x128xf32>
    %154 = arith.addf %153, %152 : vector<1x128xf32>
    %155 = arith.divf %153, %154 : vector<1x128xf32>
    %156 = vector.extract_strided_slice %141 {offsets = [0, 256], sizes = [1, 128], strides = [1, 1]} : vector<1x384xf32> to vector<1x128xf32>
    %157 = arith.addf %156, %11 : vector<1x128xf32>
    %158 = arith.mulf %148, %157 : vector<1x128xf32>
    %159 = arith.addf %140, %158 : vector<1x128xf32>
    %160 = math.tanh %159 : vector<1x128xf32>
    %cst_40 = arith.constant 1.000000e+00 : f32
    %161 = vector.broadcast %cst_40 : f32 to vector<1x128xf32>
    %162 = arith.subf %161, %155 : vector<1x128xf32>
    %163 = arith.mulf %162, %160 : vector<1x128xf32>
    %164 = arith.mulf %155, %135 : vector<1x128xf32>
    %165 = arith.addf %163, %164 : vector<1x128xf32>
    %c4 = arith.constant 4 : index
    %c0_41 = arith.constant 0 : index
    %166 = vector.load %arg11[%c4, %c0_41] : memref<8x128xf32, #tpu.memory_space<vmem>>, vector<1x128xf32>
    tpu.vector_store %arg11[%c4, %c0_41], %165 {strides = array<i32>} : memref<8x128xf32, #tpu.memory_space<vmem>>, vector<1x128xf32>,
    %167 = vector.extract_strided_slice %16 {offsets = [5, 0], sizes = [1, 384], strides = [1, 1]} : vector<8x384xf32> to vector<1x384xf32>
    %168 = vector.extract_strided_slice %167 {offsets = [0, 0], sizes = [1, 128], strides = [1, 1]} : vector<1x384xf32> to vector<1x128xf32>
    %169 = vector.extract_strided_slice %167 {offsets = [0, 128], sizes = [1, 128], strides = [1, 1]} : vector<1x384xf32> to vector<1x128xf32>
    %170 = vector.extract_strided_slice %167 {offsets = [0, 256], sizes = [1, 128], strides = [1, 1]} : vector<1x384xf32> to vector<1x128xf32>
    %cst_42 = arith.constant dense<0.000000e+00> : vector<1x384xf32>
    %171 = tpu.matmul %165, %10, %cst_42 {dimension_numbers = #tpu.dot_dimension_numbers<[1], [0], [0], [1], [0, 0, 1, 1], [], []>} : vector<1x128xf32>, vector<128x384xf32>, vector<1x384xf32> -> vector<1x384xf32>
    %172 = vector.extract_strided_slice %171 {offsets = [0, 0], sizes = [1, 128], strides = [1, 1]} : vector<1x384xf32> to vector<1x128xf32>
    %173 = arith.addf %168, %172 : vector<1x128xf32>
    %174 = arith.negf %173 : vector<1x128xf32>
    %175 = math.exp %174 : vector<1x128xf32>
    %cst_43 = arith.constant 1.000000e+00 : f32
    %176 = vector.broadcast %cst_43 : f32 to vector<1x128xf32>
    %177 = arith.addf %176, %175 : vector<1x128xf32>
    %178 = arith.divf %176, %177 : vector<1x128xf32>
    %179 = vector.extract_strided_slice %171 {offsets = [0, 128], sizes = [1, 128], strides = [1, 1]} : vector<1x384xf32> to vector<1x128xf32>
    %180 = arith.addf %169, %179 : vector<1x128xf32>
    %181 = arith.negf %180 : vector<1x128xf32>
    %182 = math.exp %181 : vector<1x128xf32>
    %cst_44 = arith.constant 1.000000e+00 : f32
    %183 = vector.broadcast %cst_44 : f32 to vector<1x128xf32>
    %184 = arith.addf %183, %182 : vector<1x128xf32>
    %185 = arith.divf %183, %184 : vector<1x128xf32>
    %186 = vector.extract_strided_slice %171 {offsets = [0, 256], sizes = [1, 128], strides = [1, 1]} : vector<1x384xf32> to vector<1x128xf32>
    %187 = arith.addf %186, %11 : vector<1x128xf32>
    %188 = arith.mulf %178, %187 : vector<1x128xf32>
    %189 = arith.addf %170, %188 : vector<1x128xf32>
    %190 = math.tanh %189 : vector<1x128xf32>
    %cst_45 = arith.constant 1.000000e+00 : f32
    %191 = vector.broadcast %cst_45 : f32 to vector<1x128xf32>
    %192 = arith.subf %191, %185 : vector<1x128xf32>
    %193 = arith.mulf %192, %190 : vector<1x128xf32>
    %194 = arith.mulf %185, %165 : vector<1x128xf32>
    %195 = arith.addf %193, %194 : vector<1x128xf32>
    %c5 = arith.constant 5 : index
    %c0_46 = arith.constant 0 : index
    %196 = vector.load %arg11[%c5, %c0_46] : memref<8x128xf32, #tpu.memory_space<vmem>>, vector<1x128xf32>
    tpu.vector_store %arg11[%c5, %c0_46], %195 {strides = array<i32>} : memref<8x128xf32, #tpu.memory_space<vmem>>, vector<1x128xf32>,
    %197 = vector.extract_strided_slice %16 {offsets = [6, 0], sizes = [1, 384], strides = [1, 1]} : vector<8x384xf32> to vector<1x384xf32>
    %198 = vector.extract_strided_slice %197 {offsets = [0, 0], sizes = [1, 128], strides = [1, 1]} : vector<1x384xf32> to vector<1x128xf32>
    %199 = vector.extract_strided_slice %197 {offsets = [0, 128], sizes = [1, 128], strides = [1, 1]} : vector<1x384xf32> to vector<1x128xf32>
    %200 = vector.extract_strided_slice %197 {offsets = [0, 256], sizes = [1, 128], strides = [1, 1]} : vector<1x384xf32> to vector<1x128xf32>
    %cst_47 = arith.constant dense<0.000000e+00> : vector<1x384xf32>
    %201 = tpu.matmul %195, %10, %cst_47 {dimension_numbers = #tpu.dot_dimension_numbers<[1], [0], [0], [1], [0, 0, 1, 1], [], []>} : vector<1x128xf32>, vector<128x384xf32>, vector<1x384xf32> -> vector<1x384xf32>
    %202 = vector.extract_strided_slice %201 {offsets = [0, 0], sizes = [1, 128], strides = [1, 1]} : vector<1x384xf32> to vector<1x128xf32>
    %203 = arith.addf %198, %202 : vector<1x128xf32>
    %204 = arith.negf %203 : vector<1x128xf32>
    %205 = math.exp %204 : vector<1x128xf32>
    %cst_48 = arith.constant 1.000000e+00 : f32
    %206 = vector.broadcast %cst_48 : f32 to vector<1x128xf32>
    %207 = arith.addf %206, %205 : vector<1x128xf32>
    %208 = arith.divf %206, %207 : vector<1x128xf32>
    %209 = vector.extract_strided_slice %201 {offsets = [0, 128], sizes = [1, 128], strides = [1, 1]} : vector<1x384xf32> to vector<1x128xf32>
    %210 = arith.addf %199, %209 : vector<1x128xf32>
    %211 = arith.negf %210 : vector<1x128xf32>
    %212 = math.exp %211 : vector<1x128xf32>
    %cst_49 = arith.constant 1.000000e+00 : f32
    %213 = vector.broadcast %cst_49 : f32 to vector<1x128xf32>
    %214 = arith.addf %213, %212 : vector<1x128xf32>
    %215 = arith.divf %213, %214 : vector<1x128xf32>
    %216 = vector.extract_strided_slice %201 {offsets = [0, 256], sizes = [1, 128], strides = [1, 1]} : vector<1x384xf32> to vector<1x128xf32>
    %217 = arith.addf %216, %11 : vector<1x128xf32>
    %218 = arith.mulf %208, %217 : vector<1x128xf32>
    %219 = arith.addf %200, %218 : vector<1x128xf32>
    %220 = math.tanh %219 : vector<1x128xf32>
    %cst_50 = arith.constant 1.000000e+00 : f32
    %221 = vector.broadcast %cst_50 : f32 to vector<1x128xf32>
    %222 = arith.subf %221, %215 : vector<1x128xf32>
    %223 = arith.mulf %222, %220 : vector<1x128xf32>
    %224 = arith.mulf %215, %195 : vector<1x128xf32>
    %225 = arith.addf %223, %224 : vector<1x128xf32>
    %c6 = arith.constant 6 : index
    %c0_51 = arith.constant 0 : index
    %226 = vector.load %arg11[%c6, %c0_51] : memref<8x128xf32, #tpu.memory_space<vmem>>, vector<1x128xf32>
    tpu.vector_store %arg11[%c6, %c0_51], %225 {strides = array<i32>} : memref<8x128xf32, #tpu.memory_space<vmem>>, vector<1x128xf32>,
    %227 = vector.extract_strided_slice %16 {offsets = [7, 0], sizes = [1, 384], strides = [1, 1]} : vector<8x384xf32> to vector<1x384xf32>
    %228 = vector.extract_strided_slice %227 {offsets = [0, 0], sizes = [1, 128], strides = [1, 1]} : vector<1x384xf32> to vector<1x128xf32>
    %229 = vector.extract_strided_slice %227 {offsets = [0, 128], sizes = [1, 128], strides = [1, 1]} : vector<1x384xf32> to vector<1x128xf32>
    %230 = vector.extract_strided_slice %227 {offsets = [0, 256], sizes = [1, 128], strides = [1, 1]} : vector<1x384xf32> to vector<1x128xf32>
    %cst_52 = arith.constant dense<0.000000e+00> : vector<1x384xf32>
    %231 = tpu.matmul %225, %10, %cst_52 {dimension_numbers = #tpu.dot_dimension_numbers<[1], [0], [0], [1], [0, 0, 1, 1], [], []>} : vector<1x128xf32>, vector<128x384xf32>, vector<1x384xf32> -> vector<1x384xf32>
    %232 = vector.extract_strided_slice %231 {offsets = [0, 0], sizes = [1, 128], strides = [1, 1]} : vector<1x384xf32> to vector<1x128xf32>
    %233 = arith.addf %228, %232 : vector<1x128xf32>
    %234 = arith.negf %233 : vector<1x128xf32>
    %235 = math.exp %234 : vector<1x128xf32>
    %cst_53 = arith.constant 1.000000e+00 : f32
    %236 = vector.broadcast %cst_53 : f32 to vector<1x128xf32>
    %237 = arith.addf %236, %235 : vector<1x128xf32>
    %238 = arith.divf %236, %237 : vector<1x128xf32>
    %239 = vector.extract_strided_slice %231 {offsets = [0, 128], sizes = [1, 128], strides = [1, 1]} : vector<1x384xf32> to vector<1x128xf32>
    %240 = arith.addf %229, %239 : vector<1x128xf32>
    %241 = arith.negf %240 : vector<1x128xf32>
    %242 = math.exp %241 : vector<1x128xf32>
    %cst_54 = arith.constant 1.000000e+00 : f32
    %243 = vector.broadcast %cst_54 : f32 to vector<1x128xf32>
    %244 = arith.addf %243, %242 : vector<1x128xf32>
    %245 = arith.divf %243, %244 : vector<1x128xf32>
    %246 = vector.extract_strided_slice %231 {offsets = [0, 256], sizes = [1, 128], strides = [1, 1]} : vector<1x384xf32> to vector<1x128xf32>
    %247 = arith.addf %246, %11 : vector<1x128xf32>
    %248 = arith.mulf %238, %247 : vector<1x128xf32>
    %249 = arith.addf %230, %248 : vector<1x128xf32>
    %250 = math.tanh %249 : vector<1x128xf32>
    %cst_55 = arith.constant 1.000000e+00 : f32
    %251 = vector.broadcast %cst_55 : f32 to vector<1x128xf32>
    %252 = arith.subf %251, %245 : vector<1x128xf32>
    %253 = arith.mulf %252, %250 : vector<1x128xf32>
    %254 = arith.mulf %245, %225 : vector<1x128xf32>
    %255 = arith.addf %253, %254 : vector<1x128xf32>
    %c7 = arith.constant 7 : index
    %c0_56 = arith.constant 0 : index
    %256 = vector.load %arg11[%c7, %c0_56] : memref<8x128xf32, #tpu.memory_space<vmem>>, vector<1x128xf32>
    tpu.vector_store %arg11[%c7, %c0_56], %255 {strides = array<i32>} : memref<8x128xf32, #tpu.memory_space<vmem>>, vector<1x128xf32>,
    %c0_57 = arith.constant 0 : index
    %c0_58 = arith.constant 0 : index
    %257 = vector.load %arg11[%c0_57, %c0_58] : memref<8x128xf32, #tpu.memory_space<vmem>>, vector<8x128xf32>
    %258 = arith.index_cast %14 : i32 to index
    %c0_59 = arith.constant 0 : index
    %259 = vector.load %arg7[%258, %c0_59] : memref<8x128xf32, #tpu.memory_space<vmem>>, vector<8x128xf32>
    tpu.vector_store %arg7[%258, %c0_59], %257 {strides = array<i32>} : memref<8x128xf32, #tpu.memory_space<vmem>>, vector<8x128xf32>,
    %c1_i32 = arith.constant 1 : i32
    %c0_60 = arith.constant 0 : index
    %c0_61 = arith.constant 0 : index
    %260 = vector.load %arg9[%c0_60, %c0_61] : memref<1x128xf32, #tpu.memory_space<vmem>>, vector<1x128xf32>
    tpu.vector_store %arg9[%c0_60, %c0_61], %255 {strides = array<i32>} : memref<1x128xf32, #tpu.memory_space<vmem>>, vector<1x128xf32>,
    %c0_i32_62 = arith.constant 0 : i32
    %261 = arith.cmpi eq, %arg0, %c0_i32_62 : i32
    %262 = arith.extui %261 : i1 to i32
    %c0_i32_63 = arith.constant 0 : i32
    %263 = arith.cmpi ne, %262, %c0_i32_63 : i32
    scf.if %263 {
      %c7_64 = arith.constant 7 : index
      %c0_65 = arith.constant 0 : index
      %264 = vector.load %arg7[%c7_64, %c0_65] : memref<8x128xf32, #tpu.memory_space<vmem>>, vector<1x128xf32>
      %c0_66 = arith.constant 0 : index
      %c0_67 = arith.constant 0 : index
      %265 = vector.load %arg8[%c0_66, %c0_67] : memref<1x128xf32, #tpu.memory_space<vmem>>, vector<1x128xf32>
      tpu.vector_store %arg8[%c0_66, %c0_67], %264 {strides = array<i32>} : memref<1x128xf32, #tpu.memory_space<vmem>>, vector<1x128xf32>,
    } else {
    }
    return
  }
  func.func @transform_0(%arg0: i32) -> (i32, i32) {
    %c0_i32 = arith.constant 0 : i32
    %c0_i32_0 = arith.constant 0 : i32
    return %arg0, %c0_i32 : i32, i32
  }
  func.func @transform_1(%arg0: i32) -> (i32, i32) {
    %c0_i32 = arith.constant 0 : i32
    %c0_i32_0 = arith.constant 0 : i32
    %c0_i32_1 = arith.constant 0 : i32
    return %c0_i32, %c0_i32_0 : i32, i32
  }
  func.func @transform_2(%arg0: i32) -> (i32, i32) {
    %c0_i32 = arith.constant 0 : i32
    %c0_i32_0 = arith.constant 0 : i32
    %c0_i32_1 = arith.constant 0 : i32
    return %c0_i32, %c0_i32_0 : i32, i32
  }
  func.func @transform_3(%arg0: i32) -> (i32, i32) {
    %c0_i32 = arith.constant 0 : i32
    %c0_i32_0 = arith.constant 0 : i32
    %c0_i32_1 = arith.constant 0 : i32
    return %c0_i32, %c0_i32_0 : i32, i32
  }
  func.func @transform_4(%arg0: i32) -> (i32, i32) {
    %c0_i32 = arith.constant 0 : i32
    %c0_i32_0 = arith.constant 0 : i32
    %c0_i32_1 = arith.constant 0 : i32
    return %c0_i32, %c0_i32_0 : i32, i32
  }
  func.func @transform_5(%arg0: i32) -> (i32, i32) {
    %c0_i32 = arith.constant 0 : i32
    %c0_i32_0 = arith.constant 0 : i32
    %c0_i32_1 = arith.constant 0 : i32
    return %c0_i32, %c0_i32_0 : i32, i32
  }
  func.func @transform_6(%arg0: i32) -> (i32, i32) {
    %c0_i32 = arith.constant 0 : i32
    %c0_i32_0 = arith.constant 0 : i32
    return %arg0, %c0_i32 : i32, i32
  }
  func.func @transform_7(%arg0: i32) -> (i32, i32) {
    %c0_i32 = arith.constant 0 : i32
    %c0_i32_0 = arith.constant 0 : i32
    %c0_i32_1 = arith.constant 0 : i32
    return %c0_i32, %c0_i32_0 : i32, i32
  }
}

</mosaic_0001>

<bundles_post_ra>
// kernel: tpu_custom_call.1
= control target key start
LH: loop header
LB: loop body
LE: loop exit
PB: predicated region body
PF: predicated region fallthrough
CT: control target
= control target key end

     0   :  { %13 = vsyncpa [#allocation6], 0  ;;  %s3321_s0 = inlined_call_operand.hbm [shape: f32[8,16], index: 0, kind: input, shape index: {}]   ;;  %s3322_s1 = inlined_call_operand.hbm [shape: f32[16,384], index: 1, kind: input, shape index: {}]   ;;  %s3323_s2 = inlined_call_operand.hbm [shape: f32[128,384], index: 2, kind: input, shape index: {}]   ;;  %s3324_s3 = inlined_call_operand.vmem [shape: f32[1,384], index: 3, kind: input, shape index: {}]   ;;  %s3325_s4 = inlined_call_operand.vmem [shape: f32[1,128], index: 4, kind: input, shape index: {}]   ;;  %s3326_s5 = inlined_call_operand.vmem [shape: f32[1,128], index: 5, kind: input, shape index: {}]   ;;  %s3327_s6 = inlined_call_operand.hbm [shape: f32[8,128], index: 6, kind: output, shape index: {0}]   ;;  %s3328_s7 = inlined_call_operand.hbm [shape: f32[1,128], index: 7, kind: output, shape index: {1}]  }
   0x1   :  { %14 = vsyncpa [#allocation9], 0 }
   0x2   :  { %15 = vsyncpa [#allocation7], 0 }
   0x3   :  { %16 = vsyncpa [#allocation13], 0  ;;  %s2436_s24 = smov [#allocation8]  }
   0x4   :  { %s32_s25 = sshll.u32 %s2436_s24, 4  ;;  %s33_s25 = int_to_ptr.vmem [resolvable:$true] %s32_s25 }
   0x5   :  { %s2336_s26 = scalar_lea.vmem %s33_s25, 768  ;;  %p2341_p1 = scmp.lt.s32.totalorder %s33_s25, %s33_s25 }
   0x6   :  { %p2337_p0 = scmp.ne.s32.totalorder %s33_s25, %s2336_s26  ;;  %p2342_p2 = scmp.lt.s32.totalorder %s2336_s26, %s2336_s26 }
   0x8   :  { %p2343_p3 = por %p2342_p2, %p2341_p1 }
   0xa   :  { %p2344_p4 = pnand %p2343_p3, %p2337_p0 }
   0xc   :  { %2347 = shalt.err (!%p2344_p4)
}
   0xd   :  { %s2437_s27 = smov 384   ;;  %s2438_s28 = smov 24  }
   0xe   :  { %38 = dma.hbm_to_vmem [thread:$0]  %s3322_s1, 768, %s33_s25, [#allocation9], %s2437_s27, %s2437_s27, %s2438_s28  }
   0xf   :  { %s2439_s8 = smov [#allocation5]   ;;  %s2440_s10 = smov [#allocation10]  }
  0x10   :  { %s23_s9 = sshll.u32 %s2439_s8, 4  ;;  %s44_s11 = sshll.u32 %s2440_s10, 4  ;;  %s24_s9 = int_to_ptr.vmem [resolvable:$true] %s23_s9  ;;  %s45_s11 = int_to_ptr.vmem [resolvable:$true] %s44_s11 }
  0x11   :  { %s2356_s12 = scalar_lea.vmem %s24_s9, 128  ;;  %p2361_p6 = scmp.lt.s32.totalorder %s24_s9, %s24_s9 }
  0x12   :  { %p2357_p5 = scmp.ne.s32.totalorder %s24_s9, %s2356_s12  ;;  %p2362_p7 = scmp.lt.s32.totalorder %s2356_s12, %s2356_s12 }
  0x14   :  { %p2363_p8 = por %p2362_p7, %p2361_p6 }
  0x16   :  { %p2364_p9 = pnand %p2363_p8, %p2357_p5 }
  0x18   :  { %2367 = shalt.err (!%p2364_p9)
}
  0x19   :  { %26 = dma.hbm_to_vmem [thread:$0]  %s3321_s0, 128, %s24_s9, [#allocation6]  }
  0x1a   :  { %s2376_s15 = scalar_lea.vmem %s45_s11, 6144  ;;  %p2381_p11 = scmp.lt.s32.totalorder %s45_s11, %s45_s11 }
  0x1b   :  { %p2377_p10 = scmp.ne.s32.totalorder %s45_s11, %s2376_s15  ;;  %p2382_p12 = scmp.lt.s32.totalorder %s2376_s15, %s2376_s15 }
  0x1d   :  { %p2383_p13 = por %p2382_p12, %p2381_p11 }
  0x1f   :  { %p2384_p0 = pnand %p2383_p13, %p2377_p10 }
  0x21   :  { %2387 = shalt.err (!%p2384_p0)
}
  0x22   :  { %50 = dma.hbm_to_vmem [thread:$0]  %s3323_s2, 6144, %s45_s11, [#allocation9], %s2437_s27, %s2437_s27, %s2438_s28  }
  0x23   :  { %2428 = dma.done.wait [#allocation6], 128  }
  0x24   :  { %2429 = vsyncadd [#allocation6], 4294967168 }
  0x25   :  { %2430 = dma.done.wait [#allocation9], 6912  }
  0x26   :  { %2431 = vsyncadd [#allocation9], 4294960384  ;;  %v3329_v0 = vmov 0.0   ;;  %vm2442_vm0 = vmmov 0   ;;  %v77_v1 = vld [vmem:[#allocation8 + $0x20] sm:$0xff]  ;;  %v76_v2 = vld [vmem:[#allocation8 + $0x18] sm:$0xff]  ;;  %v81_v60 = vlaneseq }
  0x27   :  { %164 = vmatprep.mubr.f32.mxu0 %v3329_v0  ;;  %1903 = vmatprep.subr.mxu1 %v3329_v0  ;;  %v74_v3 = vld [vmem:[#allocation8 + $0x8] sm:$0xff]  ;;  %v73_v4 = vld [vmem:[#allocation8] sm:$0xff]  ;;  %v72_v5 = vld [vmem:[#allocation5] sm:$0xff]  ;;  %vm96_vm1 = vcmask 130048  }
  0x28   :  { %1907 = vmatprep.mubr.msk.f32.mxu1 %vm2442_vm0, %v3329_v0  ;;  %128 = vmatprep.subr.mxu0 %v77_v1  ;;  %v2498_v6 = vld [vmem:[#allocation10 + $0x170] sm:$0xff]  ;;  %v2500_v7 = vld [vmem:[#allocation10 + $0x168] sm:$0xff]  ;;  %v2502_v8 = vld [vmem:[#allocation10 + $0x158] sm:$0xff]  ;;  %v82_v61 = vshrl.u32 %v81_v60, 7 }
  0x29   :  { %129 = vmatpush1.msra.mxu0 %v76_v2  ;;  %3353 = vst [vmem:[#allocation18_spill] sm:$0xff] %v2498_v6  ;;  %v2506_v9 = vld [vmem:[#allocation10 + $0x150] sm:$0xff]  ;;  %v2509_v10 = vld [vmem:[#allocation10 + $0x140] sm:$0xff]  ;;  %v2513_v11 = vld [vmem:[#allocation10 + $0x138] sm:$0xff] }
  0x2a   :  { %130 = vmatprep.subr.mxu0 %v74_v3  ;;  %v2516_v12 = vld [vmem:[#allocation10 + $0x128] sm:$0xff]  ;;  %v2519_v13 = vld [vmem:[#allocation10 + $0x120] sm:$0xff]  ;;  %v2522_v14 = vld [vmem:[#allocation10 + $0x110] sm:$0xff]  ;;  %v83_v62 = vsub.s32 0, %v82_v61  ;;  %v87_v3 = vsub.s32 1, %v82_v61 }
  0x2b   :  { %131 = vmatpush1.msra.mxu0 %v73_v4  ;;  %v78_v15 = vld [vmem:[#allocation8 + $0x28] sm:$0xff]  ;;  %v2525_v16 = vld [vmem:[#allocation10 + $0x108] sm:$0xff]  ;;  %v75_v17 = vld [vmem:[#allocation8 + $0x10] sm:$0xff] }
  0x2c   :  { %1746 = vmatmul.mubr.msk.f32.vlgmr.msra.gmra.mxu0 %vm96_vm1, %v72_v5  ;;  %300 = vmatprep.subr.mxu0 %v2498_v6  ;;  %v2528_v18 = vld [vmem:[#allocation10 + $0xf8] sm:$0xff]  ;;  %v2532_v19 = vld [vmem:[#allocation10 + $0xf0] sm:$0xff]  ;;  %v2540_v22 = vld [vmem:[#allocation10 + $0xe0] sm:$0xff] }
  0x2d   :  { %301 = vmatpush1.msra.mxu0 %v2500_v7  ;;  %364 = vmatprep.mubr.f32.mxu0 %v3329_v0  ;;  %v2534_v20 = vld [vmem:[#allocation10 + $0x178] sm:$0xff]  ;;  %v2547_v24 = vld [vmem:[#allocation10 + $0x160] sm:$0xff]  ;;  %v2550_v25 = vld [vmem:[#allocation10 + $0xc8] sm:$0xff] }
  0x2e   :  { %302 = vmatprep.subr.mxu0 %v2502_v8  ;;  %1904 = vmatpush3.msra.mxu1 %v78_v15  ;;  %v70_v21 = vld [vmem:[%s3326_s5] sm:$0x1]  ;;  %v2554_v26 = vld [vmem:[#allocation10 + $0xc0] sm:$0xff]  ;;  %v2557_v27 = vld [vmem:[#allocation10 + $0x148] sm:$0xff] }
  0x2f   :  { %303 = vmatpush1.msra.mxu0 %v2506_v9  ;;  %1905 = vmatprep.subr.mxu1 %v3329_v0  ;;  %71 = vst [vmem:[#allocation2] sm:$0x1] %v70_v21  ;;  %v2544_v23 = vld [vmem:[#allocation10 + $0xd8] sm:$0xff]  ;;  %v2560_v28 = vld [vmem:[#allocation10 + $0xb0] sm:$0xff]  ;;  %v2564_v29 = vld [vmem:[#allocation10 + $0xa8] sm:$0xff] }
  0x30   :  { %304 = vmatprep.subr.mxu0 %v2509_v10  ;;  %1906 = vmatpush3.msra.mxu1 %v75_v17  ;;  %v2567_v30 = vld [vmem:[#allocation10 + $0x130] sm:$0xff]  ;;  %v2570_v31 = vld [vmem:[#allocation10 + $0x98] sm:$0xff]  ;;  %v2580_v34 = vld [vmem:[#allocation10 + $0x80] sm:$0xff] }
  0x31   :  { %305 = vmatpush1.msra.mxu0 %v2513_v11  ;;  %1910 = vmatprep.subr.mxu1 %v3329_v0  ;;  %v2574_v32 = vld [vmem:[#allocation10 + $0x90] sm:$0xff]  ;;  %v2577_v33 = vld [vmem:[#allocation10 + $0x118] sm:$0xff]  ;;  %v2587_v36 = vld [vmem:[#allocation10 + $0x100] sm:$0xff] }
  0x32   :  { %306 = vmatprep.subr.mxu0 %v2516_v12  ;;  %1908 = vmatmul.mubr.msk.f32.vlgmr.msra.gmra.mxu1 %vm96_vm1, %v72_v5  ;;  %v2584_v35 = vld [vmem:[#allocation10 + $0x78] sm:$0xff]  ;;  %v2590_v37 = vld [vmem:[#allocation10 + $0x68] sm:$0xff]  ;;  %v2594_v38 = vld [vmem:[#allocation10 + $0x60] sm:$0xff] }
  0x33   :  { %307 = vmatpush1.msra.mxu0 %v2519_v13  ;;  %1911 = vmatpush3.msra.mxu1 %v2534_v20  ;;  %v2597_v39 = vld [vmem:[#allocation10 + $0xe8] sm:$0xff]  ;;  %v2600_v40 = vld [vmem:[#allocation10 + $0x50] sm:$0xff]  ;;  %v2610_v43 = vld [vmem:[#allocation10 + $0x38] sm:$0xff] }
  0x34   :  { %308 = vmatprep.subr.mxu0 %v2522_v14  ;;  %1912 = vmatprep.subr.mxu1 %v3329_v0  ;;  %v2604_v41 = vld [vmem:[#allocation10 + $0x48] sm:$0xff]  ;;  %v2607_v42 = vld [vmem:[#allocation10 + $0xd0] sm:$0xff]  ;;  %v2617_v45 = vld [vmem:[#allocation10 + $0xb8] sm:$0xff] }
  0x35   :  { %309 = vmatpush1.msra.mxu0 %v2525_v16  ;;  %1913 = vmatpush3.msra.mxu1 %v2547_v24  ;;  %v2614_v44 = vld [vmem:[#allocation10 + $0x30] sm:$0xff]  ;;  %v2620_v46 = vld [vmem:[#allocation10 + $0x20] sm:$0xff]  ;;  %v2624_v47 = vld [vmem:[#allocation10 + $0x18] sm:$0xff] }
  0x36   :  { %310 = vmatprep.subr.mxu0 %v2528_v18  ;;  %1914 = vmatprep.subr.mxu1 %v3329_v0  ;;  %3354 = vst [vmem:[#allocation19_spill] sm:$0xff] %v2620_v46  ;;  %3355 = vst [vmem:[#allocation20_spill] sm:$0xff] %v2624_v47  ;;  %v2627_v48 = vld [vmem:[#allocation10 + $0xa0] sm:$0xff]  ;;  %v2630_v49 = vld [vmem:[#allocation10 + $0x8] sm:$0xff] }
  0x37   :  { %311 = vmatpush1.msra.mxu0 %v2532_v19  ;;  %1915 = vmatpush3.msra.mxu1 %v2557_v27  ;;  %3356 = vst [vmem:[#allocation21_spill] sm:$0xff] %v2630_v49  ;;  %v2634_v50 = vld [vmem:[#allocation10] sm:$0xff]  ;;  %v2637_v51 = vld [vmem:[#allocation10 + $0x88] sm:$0xff]  ;;  %v2640_v52 = vld [vmem:[#allocation2] sm:$0x1] }
  0x38   :  { %312 = vmatprep.subr.mxu0 %v2540_v22  ;;  %1916 = vmatprep.subr.mxu1 %v3329_v0  ;;  %3357 = vst [vmem:[#allocation22_spill] sm:$0xff] %v2634_v50  ;;  %v2645_v53 = vld [vmem:[#allocation10 + $0x70] sm:$0xff]  ;;  %v2651_v54 = vld [vmem:[#allocation10 + $0x58] sm:$0xff]  ;;  %v2657_v55 = vld [vmem:[#allocation10 + $0x40] sm:$0xff] }
  0x39   :  { %313 = vmatpush1.msra.mxu0 %v2544_v23  ;;  %1917 = vmatpush3.msra.mxu1 %v2567_v30  ;;  %v2663_v56 = vld [vmem:[#allocation10 + $0x28] sm:$0xff]  ;;  %v2669_v57 = vld [vmem:[#allocation10 + $0x10] sm:$0xff]  ;;  %v79_v63 = vld [vmem:[%s3324_s3] sm:$0x7] }
  0x3a   :  { %314 = vmatprep.subr.mxu0 %v2550_v25  ;;  %1918 = vmatprep.subr.mxu1 %v3329_v0  ;;  %3358 = vst [vmem:[#allocation23_spill] sm:$0xff] %v2663_v56  ;;  %3359 = vst [vmem:[#allocation24_spill] sm:$0xff] %v2669_v57  ;;  %v84_v2 = vrot.slane %v79_v63, %v83_v62  ;;  %v88_v17 = vrot.slane %v79_v63, %v87_v3  ;;  %v2752_v3 = vld [vmem:[%s3325_s4] sm:$0x1] }
  0x3b   :  { %315 = vmatpush1.msra.mxu0 %v2554_v26  ;;  %1919 = vmatpush3.msra.mxu1 %v2577_v33 }
  0x3c   :  { %316 = vmatprep.subr.mxu0 %v2560_v28  ;;  %1920 = vmatprep.subr.mxu1 %v3329_v0 }
  0x3d   :  { %317 = vmatpush1.msra.mxu0 %v2564_v29  ;;  %1921 = vmatpush3.msra.mxu1 %v2587_v36 }
  0x3e   :  { %318 = vmatprep.subr.mxu0 %v2570_v31  ;;  %1922 = vmatprep.subr.mxu1 %v3329_v0 }
  0x3f   :  { %319 = vmatpush1.msra.mxu0 %v2574_v32  ;;  %1923 = vmatpush3.msra.mxu1 %v2597_v39 }
  0x40   :  { %320 = vmatprep.subr.mxu0 %v2580_v34  ;;  %1924 = vmatprep.subr.mxu1 %v3329_v0 }
  0x41   :  { %321 = vmatpush1.msra.mxu0 %v2584_v35  ;;  %1925 = vmatpush3.msra.mxu1 %v2607_v42 }
  0x42   :  { %322 = vmatprep.subr.mxu0 %v2590_v37  ;;  %1926 = vmatprep.subr.mxu1 %v3329_v0 }
  0x43   :  { %323 = vmatpush1.msra.mxu0 %v2594_v38  ;;  %1927 = vmatpush3.msra.mxu1 %v2617_v45 }
  0x44   :  { %324 = vmatprep.subr.mxu0 %v2600_v40  ;;  %1928 = vmatprep.subr.mxu1 %v3329_v0 }
  0x45   :  { %325 = vmatpush1.msra.mxu0 %v2604_v41  ;;  %1929 = vmatpush3.msra.mxu1 %v2627_v48 }
  0x46   :  { %326 = vmatprep.subr.mxu0 %v2610_v43  ;;  %1930 = vmatprep.subr.mxu1 %v3329_v0 }
  0x47   :  { %327 = vmatpush1.msra.mxu0 %v2614_v44  ;;  %1931 = vmatpush3.msra.mxu1 %v2637_v51 }
  0x48   :  { %328 = vmatprep.subr.mxu0 %v2620_v46  ;;  %1932 = vmatprep.subr.mxu1 %v3329_v0 }
  0x49   :  { %329 = vmatpush1.msra.mxu0 %v2624_v47  ;;  %1933 = vmatpush3.msra.mxu1 %v2645_v53 }
  0x4a   :  { %330 = vmatprep.subr.mxu0 %v2630_v49  ;;  %1942 = vmatprep.mubr.msk.f32.mxu1 %vm2442_vm0, %v3329_v0 }
  0x4b   :  { %331 = vmatpush1.msra.mxu0 %v2634_v50  ;;  %1934 = vmatprep.subr.mxu1 %v3329_v0 }
  0x4c   :  { %365 = vmatmul.mubr.f32.vlgmr.msra.gmra.mxu0 %v2640_v52  ;;  %464 = vmatprep.subr.mxu0 %v2498_v6 }
  0x4d   :  { %1935 = vmatpush3.msra.mxu1 %v2651_v54  ;;  %465 = vmatpush1.msra.mxu0 %v2500_v7 }
  0x4e   :  { %1936 = vmatprep.subr.mxu1 %v3329_v0  ;;  %466 = vmatprep.subr.mxu0 %v2502_v8 }
  0x4f   :  { %1937 = vmatpush3.msra.mxu1 %v2657_v55  ;;  %467 = vmatpush1.msra.mxu0 %v2506_v9 }
  0x50   :  { %1938 = vmatprep.subr.mxu1 %v3329_v0  ;;  %468 = vmatprep.subr.mxu0 %v2509_v10 }
  0x51   :  { %1939 = vmatpush3.msra.mxu1 %v2663_v56  ;;  %469 = vmatpush1.msra.mxu0 %v2513_v11 }
  0x52   :  { %1940 = vmatprep.subr.mxu1 %v3329_v0  ;;  %470 = vmatprep.subr.mxu0 %v2516_v12 }
  0x53   :  { %1941 = vmatpush3.msra.mxu1 %v2669_v57  ;;  %471 = vmatpush1.msra.mxu0 %v2519_v13 }
  0x54   :  { %1943 = vmatmul.mubr.f32.vlgmr.msra.gmra.mxu1 %v2640_v52  ;;  %1945 = vmatprep.subr.mxu1 %v3329_v0 }
  0x55   :  { %1946 = vmatpush3.msra.mxu1 %v2534_v20  ;;  %472 = vmatprep.subr.mxu0 %v2522_v14 }
  0x56   :  { %1947 = vmatprep.subr.mxu1 %v3329_v0  ;;  %473 = vmatpush1.msra.mxu0 %v2525_v16 }
  0x57   :  { %1948 = vmatpush3.msra.mxu1 %v2547_v24  ;;  %474 = vmatprep.subr.mxu0 %v2528_v18 }
  0x58   :  { %1949 = vmatprep.subr.mxu1 %v3329_v0  ;;  %475 = vmatpush1.msra.mxu0 %v2532_v19 }
  0x59   :  { %1950 = vmatpush3.msra.mxu1 %v2557_v27  ;;  %476 = vmatprep.subr.mxu0 %v2540_v22 }
  0x5a   :  { %1951 = vmatprep.subr.mxu1 %v3329_v0  ;;  %477 = vmatpush1.msra.mxu0 %v2544_v23 }
  0x5b   :  { %1952 = vmatpush3.msra.mxu1 %v2567_v30  ;;  %478 = vmatprep.subr.mxu0 %v2550_v25 }
  0x5c   :  { %1953 = vmatprep.subr.mxu1 %v3329_v0  ;;  %479 = vmatpush1.msra.mxu0 %v2554_v26 }
  0x5d   :  { %1954 = vmatpush3.msra.mxu1 %v2577_v33  ;;  %480 = vmatprep.subr.mxu0 %v2560_v28 }
  0x5e   :  { %1955 = vmatprep.subr.mxu1 %v3329_v0  ;;  %481 = vmatpush1.msra.mxu0 %v2564_v29 }
  0x5f   :  { %1956 = vmatpush3.msra.mxu1 %v2587_v36  ;;  %482 = vmatprep.subr.mxu0 %v2570_v31 }
  0x60   :  { %1957 = vmatprep.subr.mxu1 %v3329_v0  ;;  %483 = vmatpush1.msra.mxu0 %v2574_v32 }
  0x61   :  { %1958 = vmatpush3.msra.mxu1 %v2597_v39  ;;  %484 = vmatprep.subr.mxu0 %v2580_v34 }
  0x62   :  { %1959 = vmatprep.subr.mxu1 %v3329_v0  ;;  %485 = vmatpush1.msra.mxu0 %v2584_v35 }
  0x63   :  { %1960 = vmatpush3.msra.mxu1 %v2607_v42  ;;  %486 = vmatprep.subr.mxu0 %v2590_v37 }
  0x64   :  { %1961 = vmatprep.subr.mxu1 %v3329_v0  ;;  %487 = vmatpush1.msra.mxu0 %v2594_v38 }
  0x65   :  { %1962 = vmatpush3.msra.mxu1 %v2617_v45  ;;  %488 = vmatprep.subr.mxu0 %v2600_v40 }
  0x66   :  { %1963 = vmatprep.subr.mxu1 %v3329_v0  ;;  %489 = vmatpush1.msra.mxu0 %v2604_v41 }
  0x67   :  { %1964 = vmatpush3.msra.mxu1 %v2627_v48  ;;  %490 = vmatprep.subr.mxu0 %v2610_v43 }
  0x68   :  { %1965 = vmatprep.subr.mxu1 %v3329_v0  ;;  %491 = vmatpush1.msra.mxu0 %v2614_v44 }
  0x69   :  { %1966 = vmatpush3.msra.mxu1 %v2637_v51  ;;  %492 = vmatprep.subr.mxu0 %v2620_v46 }
  0x6a   :  { %1967 = vmatprep.subr.mxu1 %v3329_v0  ;;  %493 = vmatpush1.msra.mxu0 %v2624_v47 }
  0x6b   :  { %1968 = vmatpush3.msra.mxu1 %v2645_v53  ;;  %494 = vmatprep.subr.mxu0 %v2630_v49 }
  0x6c   :  { %1969 = vmatprep.subr.mxu1 %v3329_v0  ;;  %495 = vmatpush1.msra.mxu0 %v2634_v50 }
  0x6d   :  { %1970 = vmatpush3.msra.mxu1 %v2651_v54  ;;  %528 = vmatprep.mubr.f32.mxu0 %v3329_v0 }
  0x6e   :  { %1971 = vmatprep.subr.mxu1 %v3329_v0  ;;  %1977 = vmatprep.mubr.msk.f32.mxu1 %vm2442_vm0, %v3329_v0 }
  0x6f   :  { %1972 = vmatpush3.msra.mxu1 %v2657_v55  ;;  %643 = vmatprep.subr.mxu0 %v2498_v6 }
  0x70   :  { %1973 = vmatprep.subr.mxu1 %v3329_v0 }
  0x71   :  { %1974 = vmatpush3.msra.mxu1 %v2663_v56 }
  0x72   :  { %1975 = vmatprep.subr.mxu1 %v3329_v0 }
  0x73   :  { %1976 = vmatpush3.msra.mxu1 %v2669_v57 }
  0x74   :  { %1980 = vmatprep.subr.mxu1 %v3329_v0 }
  0xec   :  { %v166_v1 = vpop.f32.mrf.mxu0 }
  0xed   :  { %v2743_v5 = vadd.f32 %v166_v1, %v84_v2  ;;  %v91_v1 = vsub.s32 2, %v82_v61 }
  0xee   :  { %v168_v4 = vpop.f32.mrf.mxu0 }
  0xf2   :  { %v237_v58 = vpop.f32.mrf.mxu1 }
  0xf4   :  { %v1909_v59 = vpop.f32.mrf.mxu1 }
  0xf5   :  { %v2746_v59 = vadd.f32 %v168_v4, %v88_v17 }
  0xf7   :  { %3360 = vst [vmem:[#allocation25_spill] sm:$0xff] %v2746_v59 }
 0x10c   :  { %v366_v15 = vpop.f32.mrf.mxu0 }
 0x10d   :  { %v441_v21 = vadd.f32 %v366_v15, %v2743_v5  ;;  %v92_v15 = vrot.slane %v79_v63, %v91_v1  ;;  %v3364_v63 = vld [vmem:[#allocation22_spill] sm:$0xff]  ;;  %v3365_v1 = vld [vmem:[#allocation24_spill] sm:$0xff] }
 0x10e   :  { %v368_v6 = vpop.f32.mrf.mxu0 }
 0x10f   :  { %v1748_v0 = vmul.f32 -1.442695, %v441_v21  ;;  %v448_v60 = vadd.f32 %v368_v6, %v2746_v59  ;;  %v2755_v6 = vadd.f32 %v237_v58, %v92_v15  ;;  %v3363_v58 = vld [vmem:[#allocation21_spill] sm:$0xff] }
 0x111   :  { %2199 = vpow2.f32 %v1748_v0  ;;  %v1749_v50 = vmul.f32 -1.442695, %v448_v60 }
 0x113   :  { %2201 = vpow2.f32 %v1749_v50 }
 0x114   :  { %v437_v57 = vpop.f32.mrf.mxu1 }
 0x115   :  { %v455_v0 = vadd.f32 %v437_v57, %v2752_v3  ;;  %v3361_v57 = vmov 0.0  }
 0x116   :  { %v1944_v49 = vpop.f32.mrf.mxu1 }
 0x11e   :  { %v2200_v62 = vpop.eup %2199 }
 0x11f   :  { %v445_v56 = vadd.f32 1.0, %v2200_v62 }
 0x120   :  { %v2202_v2 = vpop.eup %2201 }
 0x121   :  { %2203 = vrcp.f32 %v445_v56  ;;  %v452_v4 = vadd.f32 1.0, %v2202_v2  ;;  %v3366_v2 = vld [vmem:[#allocation18_spill] sm:$0xff] }
 0x123   :  { %2205 = vrcp.f32 %v452_v4 }
 0x12e   :  { %v2204_v17 = vpop.eup %2203 }
 0x12f   :  { %v456_v49 = vmul.f32 %v2204_v17, %v455_v0 }
 0x130   :  { %v2206_v56 = vpop.eup %2205 }
 0x131   :  { %v457_v50 = vadd.f32 %v456_v49, %v2755_v6  ;;  %v459_v61 = vsub.f32 1.0, %v2206_v56  ;;  %v461_v62 = vmul.f32 %v2206_v56, %v2640_v52  ;;  %v3362_v52 = vld [vmem:[#allocation23_spill] sm:$0xff] }
 0x133   :  { %2207 = vtanh.f32 %v457_v50 }
 0x140   :  { %v2208_v21 = vpop.eup %2207 }
 0x141   :  { %v460_v60 = vmul.f32 %v2208_v21, %v459_v61  ;;  %v3367_v21 = vld [vmem:[#allocation25_spill] sm:$0xff] }
 0x143   :  { %v2759_v59 = vadd.f32 %v461_v62, %v460_v60 }
 0x145   :  { %463 = vst [vmem:[#allocation4] sm:$0x1] %v2759_v59  ;;  %529 = vmatmul.mubr.f32.vlgmr.msra.gmra.mxu0 %v2759_v59  ;;  %1978 = vmatmul.mubr.f32.vlgmr.msra.gmra.mxu1 %v2759_v59 }
 0x146   :  { %644 = vmatpush1.msra.mxu0 %v2500_v7  ;;  %1981 = vmatpush3.msra.mxu1 %v2534_v20 }
 0x147   :  { %645 = vmatprep.subr.mxu0 %v2502_v8  ;;  %1982 = vmatprep.subr.mxu1 %v3361_v57 }
 0x148   :  { %646 = vmatpush1.msra.mxu0 %v2506_v9  ;;  %1983 = vmatpush3.msra.mxu1 %v2547_v24 }
 0x149   :  { %647 = vmatprep.subr.mxu0 %v2509_v10  ;;  %1984 = vmatprep.subr.mxu1 %v3361_v57 }
 0x14a   :  { %648 = vmatpush1.msra.mxu0 %v2513_v11  ;;  %1985 = vmatpush3.msra.mxu1 %v2557_v27 }
 0x14b   :  { %649 = vmatprep.subr.mxu0 %v2516_v12  ;;  %1986 = vmatprep.subr.mxu1 %v3361_v57 }
 0x14c   :  { %650 = vmatpush1.msra.mxu0 %v2519_v13  ;;  %1987 = vmatpush3.msra.mxu1 %v2567_v30 }
 0x14d   :  { %651 = vmatprep.subr.mxu0 %v2522_v14  ;;  %1988 = vmatprep.subr.mxu1 %v3361_v57 }
 0x14e   :  { %652 = vmatpush1.msra.mxu0 %v2525_v16  ;;  %1989 = vmatpush3.msra.mxu1 %v2577_v33 }
 0x14f   :  { %653 = vmatprep.subr.mxu0 %v2528_v18  ;;  %1990 = vmatprep.subr.mxu1 %v3361_v57 }
 0x150   :  { %654 = vmatpush1.msra.mxu0 %v2532_v19  ;;  %1991 = vmatpush3.msra.mxu1 %v2587_v36 }
 0x151   :  { %655 = vmatprep.subr.mxu0 %v2540_v22  ;;  %1992 = vmatprep.subr.mxu1 %v3361_v57 }
 0x152   :  { %656 = vmatpush1.msra.mxu0 %v2544_v23  ;;  %1993 = vmatpush3.msra.mxu1 %v2597_v39 }
 0x153   :  { %657 = vmatprep.subr.mxu0 %v2550_v25  ;;  %1994 = vmatprep.subr.mxu1 %v3361_v57 }
 0x154   :  { %658 = vmatpush1.msra.mxu0 %v2554_v26  ;;  %1995 = vmatpush3.msra.mxu1 %v2607_v42 }
 0x155   :  { %659 = vmatprep.subr.mxu0 %v2560_v28  ;;  %1996 = vmatprep.subr.mxu1 %v3361_v57 }
 0x156   :  { %660 = vmatpush1.msra.mxu0 %v2564_v29  ;;  %1997 = vmatpush3.msra.mxu1 %v2617_v45 }
 0x157   :  { %661 = vmatprep.subr.mxu0 %v2570_v31  ;;  %1998 = vmatprep.subr.mxu1 %v3361_v57 }
 0x158   :  { %662 = vmatpush1.msra.mxu0 %v2574_v32  ;;  %1999 = vmatpush3.msra.mxu1 %v2627_v48 }
 0x159   :  { %663 = vmatprep.subr.mxu0 %v2580_v34  ;;  %2000 = vmatprep.subr.mxu1 %v3361_v57 }
 0x15a   :  { %664 = vmatpush1.msra.mxu0 %v2584_v35  ;;  %2001 = vmatpush3.msra.mxu1 %v2637_v51 }
 0x15b   :  { %665 = vmatprep.subr.mxu0 %v2590_v37  ;;  %2002 = vmatprep.subr.mxu1 %v3361_v57 }
 0x15c   :  { %666 = vmatpush1.msra.mxu0 %v2594_v38  ;;  %2003 = vmatpush3.msra.mxu1 %v2645_v53 }
 0x15d   :  { %667 = vmatprep.subr.mxu0 %v2600_v40  ;;  %2004 = vmatprep.subr.mxu1 %v3361_v57 }
 0x15e   :  { %668 = vmatpush1.msra.mxu0 %v2604_v41  ;;  %2005 = vmatpush3.msra.mxu1 %v2651_v54 }
 0x15f   :  { %669 = vmatprep.subr.mxu0 %v2610_v43  ;;  %2006 = vmatprep.subr.mxu1 %v3361_v57 }
 0x160   :  { %670 = vmatpush1.msra.mxu0 %v2614_v44  ;;  %2007 = vmatpush3.msra.mxu1 %v2657_v55 }
 0x161   :  { %671 = vmatprep.subr.mxu0 %v2620_v46  ;;  %2008 = vmatprep.subr.mxu1 %v3361_v57 }
 0x162   :  { %672 = vmatpush1.msra.mxu0 %v2624_v47  ;;  %2009 = vmatpush3.msra.mxu1 %v3362_v52 }
 0x163   :  { %673 = vmatprep.subr.mxu0 %v3363_v58  ;;  %2010 = vmatprep.subr.mxu1 %v3361_v57 }
 0x164   :  { %674 = vmatpush1.msra.mxu0 %v3364_v63  ;;  %707 = vmatprep.mubr.f32.mxu0 %v3361_v57 }
 0x165   :  { %2011 = vmatpush3.msra.mxu1 %v3365_v1  ;;  %2012 = vmatprep.mubr.msk.f32.mxu1 %vm2442_vm0, %v3361_v57 }
 0x166   :  { %821 = vmatprep.subr.mxu0 %v3366_v2  ;;  %2015 = vmatprep.subr.mxu1 %v3361_v57 }
 0x205   :  { %v530_v15 = vpop.f32.mrf.mxu0  ;;  %v601_v4 = vpop.f32.mrf.mxu1 }
 0x206   :  { %v606_v0 = vrot.slane %v530_v15, 7  ;;  %v625_v58 = vadd.f32 %v601_v4, %v2752_v3  ;;  %v3374_v4 = vld [vmem:[#allocation18_spill] sm:$0xff] }
 0x207   :  { %v532_v17 = vpop.f32.mrf.mxu0  ;;  %v1979_v49 = vpop.f32.mrf.mxu1 }
 0x208   :  { %v608_v50 = vadd.f32 %v606_v0, %v2743_v5  ;;  %v616_v61 = vrot.slane %v532_v17, 7  ;;  %v627_v47 = vrot.slane %v625_v58, 7  ;;  %v635_v49 = vrot.slane %v2759_v59, 7  ;;  %v3370_v59 = vld [vmem:[#allocation23_spill] sm:$0xff]  ;;  %v3372_v58 = vld [vmem:[#allocation22_spill] sm:$0xff] }
 0x20a   :  { %v1750_v56 = vmul.f32 -1.442695, %v608_v50  ;;  %v618_v60 = vadd.f32 %v616_v61, %v3367_v21 }
 0x20c   :  { %2209 = vpow2.f32 %v1750_v56  ;;  %v1751_v62 = vmul.f32 -1.442695, %v618_v60 }
 0x20e   :  { %2211 = vpow2.f32 %v1751_v62 }
 0x219   :  { %v2210_v1 = vpop.eup %2209 }
 0x21a   :  { %v612_v63 = vadd.f32 1.0, %v2210_v1 }
 0x21b   :  { %v2212_v2 = vpop.eup %2211 }
 0x21c   :  { %2213 = vrcp.f32 %v612_v63  ;;  %v622_v52 = vadd.f32 1.0, %v2212_v2  ;;  %v3373_v2 = vld [vmem:[#allocation24_spill] sm:$0xff] }
 0x21e   :  { %2215 = vrcp.f32 %v622_v52  ;;  %v3371_v52 = vld [vmem:[#allocation21_spill] sm:$0xff] }
 0x229   :  { %v2214_v15 = vpop.eup %2213 }
 0x22a   :  { %v629_v46 = vmul.f32 %v2214_v15, %v627_v47  ;;  %v3369_v47 = vld [vmem:[#allocation20_spill] sm:$0xff] }
 0x22b   :  { %v2216_v17 = vpop.eup %2215 }
 0x22c   :  { %v630_v0 = vadd.f32 %v629_v46, %v2755_v6  ;;  %v632_v50 = vsub.f32 1.0, %v2216_v17  ;;  %v637_v60 = vmul.f32 %v2216_v17, %v635_v49  ;;  %v3368_v46 = vld [vmem:[#allocation19_spill] sm:$0xff] }
 0x22e   :  { %2217 = vtanh.f32 %v630_v0 }
 0x23b   :  { %v2218_v56 = vpop.eup %2217 }
 0x23c   :  { %v633_v61 = vmul.f32 %v2218_v56, %v632_v50 }
 0x23e   :  { %v2836_v1 = vadd.f32 %v637_v60, %v633_v61 }
 0x240   :  { %639 = vst [vmem:[#allocation4] sm:$0x2] %v2836_v1  ;;  %v641_v63 = vrot.slane %v2836_v1, 1 }
 0x242   :  { %708 = vmatmul.mubr.f32.vlgmr.msra.gmra.mxu0 %v641_v63  ;;  %2013 = vmatmul.mubr.f32.vlgmr.msra.gmra.mxu1 %v641_v63 }
 0x243   :  { %822 = vmatpush1.msra.mxu0 %v2500_v7  ;;  %2016 = vmatpush3.msra.mxu1 %v2534_v20 }
 0x244   :  { %823 = vmatprep.subr.mxu0 %v2502_v8  ;;  %2017 = vmatprep.subr.mxu1 %v3361_v57 }
 0x245   :  { %824 = vmatpush1.msra.mxu0 %v2506_v9  ;;  %2018 = vmatpush3.msra.mxu1 %v2547_v24 }
 0x246   :  { %825 = vmatprep.subr.mxu0 %v2509_v10  ;;  %2019 = vmatprep.subr.mxu1 %v3361_v57 }
 0x247   :  { %826 = vmatpush1.msra.mxu0 %v2513_v11  ;;  %2020 = vmatpush3.msra.mxu1 %v2557_v27 }
 0x248   :  { %827 = vmatprep.subr.mxu0 %v2516_v12  ;;  %2021 = vmatprep.subr.mxu1 %v3361_v57 }
 0x249   :  { %828 = vmatpush1.msra.mxu0 %v2519_v13  ;;  %2022 = vmatpush3.msra.mxu1 %v2567_v30 }
 0x24a   :  { %829 = vmatprep.subr.mxu0 %v2522_v14  ;;  %2023 = vmatprep.subr.mxu1 %v3361_v57 }
 0x24b   :  { %830 = vmatpush1.msra.mxu0 %v2525_v16  ;;  %2024 = vmatpush3.msra.mxu1 %v2577_v33 }
 0x24c   :  { %831 = vmatprep.subr.mxu0 %v2528_v18  ;;  %2025 = vmatprep.subr.mxu1 %v3361_v57 }
 0x24d   :  { %832 = vmatpush1.msra.mxu0 %v2532_v19  ;;  %2026 = vmatpush3.msra.mxu1 %v2587_v36 }
 0x24e   :  { %833 = vmatprep.subr.mxu0 %v2540_v22  ;;  %2027 = vmatprep.subr.mxu1 %v3361_v57 }
 0x24f   :  { %834 = vmatpush1.msra.mxu0 %v2544_v23  ;;  %2028 = vmatpush3.msra.mxu1 %v2597_v39 }
 0x250   :  { %835 = vmatprep.subr.mxu0 %v2550_v25  ;;  %2029 = vmatprep.subr.mxu1 %v3361_v57 }
 0x251   :  { %836 = vmatpush1.msra.mxu0 %v2554_v26  ;;  %2030 = vmatpush3.msra.mxu1 %v2607_v42 }
 0x252   :  { %837 = vmatprep.subr.mxu0 %v2560_v28  ;;  %2031 = vmatprep.subr.mxu1 %v3361_v57 }
 0x253   :  { %838 = vmatpush1.msra.mxu0 %v2564_v29  ;;  %2032 = vmatpush3.msra.mxu1 %v2617_v45 }
 0x254   :  { %839 = vmatprep.subr.mxu0 %v2570_v31  ;;  %2033 = vmatprep.subr.mxu1 %v3361_v57 }
 0x255   :  { %840 = vmatpush1.msra.mxu0 %v2574_v32  ;;  %2034 = vmatpush3.msra.mxu1 %v2627_v48 }
 0x256   :  { %841 = vmatprep.subr.mxu0 %v2580_v34  ;;  %2035 = vmatprep.subr.mxu1 %v3361_v57 }
 0x257   :  { %842 = vmatpush1.msra.mxu0 %v2584_v35  ;;  %2036 = vmatpush3.msra.mxu1 %v2637_v51 }
 0x258   :  { %843 = vmatprep.subr.mxu0 %v2590_v37  ;;  %2037 = vmatprep.subr.mxu1 %v3361_v57 }
 0x259   :  { %844 = vmatpush1.msra.mxu0 %v2594_v38  ;;  %2038 = vmatpush3.msra.mxu1 %v2645_v53 }
 0x25a   :  { %845 = vmatprep.subr.mxu0 %v2600_v40  ;;  %2039 = vmatprep.subr.mxu1 %v3361_v57 }
 0x25b   :  { %846 = vmatpush1.msra.mxu0 %v2604_v41  ;;  %2040 = vmatpush3.msra.mxu1 %v2651_v54 }
 0x25c   :  { %847 = vmatprep.subr.mxu0 %v2610_v43  ;;  %2041 = vmatprep.subr.mxu1 %v3361_v57 }
 0x25d   :  { %848 = vmatpush1.msra.mxu0 %v2614_v44  ;;  %2042 = vmatpush3.msra.mxu1 %v2657_v55 }
 0x25e   :  { %849 = vmatprep.subr.mxu0 %v3368_v46  ;;  %2043 = vmatprep.subr.mxu1 %v3361_v57 }
 0x25f   :  { %850 = vmatpush1.msra.mxu0 %v3369_v47  ;;  %2044 = vmatpush3.msra.mxu1 %v3370_v59 }
 0x260   :  { %851 = vmatprep.subr.mxu0 %v3371_v52  ;;  %2045 = vmatprep.subr.mxu1 %v3361_v57 }
 0x261   :  { %852 = vmatpush1.msra.mxu0 %v3372_v58  ;;  %885 = vmatprep.mubr.f32.mxu0 %v3361_v57 }
 0x262   :  { %2046 = vmatpush3.msra.mxu1 %v3373_v2  ;;  %2047 = vmatprep.mubr.msk.f32.mxu1 %vm2442_vm0, %v3361_v57 }
 0x263   :  { %999 = vmatprep.subr.mxu0 %v3374_v4  ;;  %2050 = vmatprep.subr.mxu1 %v3361_v57 }
 0x302   :  { %v709_v62 = vpop.f32.mrf.mxu0  ;;  %v780_v15 = vpop.f32.mrf.mxu1 }
 0x303   :  { %v785_v0 = vrot.slane %v709_v62, 6  ;;  %v804_v52 = vadd.f32 %v780_v15, %v2752_v3  ;;  %v2995_v15 = vld [vmem:[#allocation10 + $0x178] sm:$0xff] }
 0x304   :  { %v711_v17 = vpop.f32.mrf.mxu0  ;;  %v2014_v49 = vpop.f32.mrf.mxu1 }
 0x305   :  { %v787_v50 = vadd.f32 %v785_v0, %v2743_v5  ;;  %v795_v61 = vrot.slane %v711_v17, 6  ;;  %v806_v47 = vrot.slane %v804_v52, 6 }
 0x307   :  { %v1752_v56 = vmul.f32 -1.442695, %v787_v50  ;;  %v797_v60 = vadd.f32 %v795_v61, %v3367_v21  ;;  %v813_v50 = vrot.slane %v2836_v1, 7 }
 0x309   :  { %2219 = vpow2.f32 %v1752_v56  ;;  %v1753_v63 = vmul.f32 -1.442695, %v797_v60 }
 0x30b   :  { %2221 = vpow2.f32 %v1753_v63  ;;  %v2998_v63 = vld [vmem:[#allocation10 + $0x158] sm:$0xff] }
 0x316   :  { %v2220_v2 = vpop.eup %2219 }
 0x317   :  { %v791_v58 = vadd.f32 1.0, %v2220_v2 }
 0x318   :  { %v2222_v4 = vpop.eup %2221 }
 0x319   :  { %2223 = vrcp.f32 %v791_v58  ;;  %v801_v59 = vadd.f32 1.0, %v2222_v4  ;;  %v2992_v4 = vld [vmem:[#allocation10 + $0x168] sm:$0xff] }
 0x31b   :  { %2225 = vrcp.f32 %v801_v59 }
 0x326   :  { %v2224_v62 = vpop.eup %2223 }
 0x327   :  { %v808_v46 = vmul.f32 %v2224_v62, %v806_v47  ;;  %v3002_v62 = vld [vmem:[#allocation10 + $0x150] sm:$0xff] }
 0x328   :  { %v2226_v17 = vpop.eup %2225 }
 0x329   :  { %v809_v0 = vadd.f32 %v808_v46, %v2755_v6  ;;  %v811_v49 = vsub.f32 1.0, %v2226_v17  ;;  %v815_v60 = vmul.f32 %v2226_v17, %v813_v50  ;;  %v3008_v17 = vld [vmem:[#allocation10 + $0x140] sm:$0xff]  ;;  %v3016_v50 = vld [vmem:[#allocation10 + $0x128] sm:$0xff] }
 0x32b   :  { %2227 = vtanh.f32 %v809_v0  ;;  %v3005_v0 = vld [vmem:[#allocation10 + $0x160] sm:$0xff] }
 0x338   :  { %v2228_v56 = vpop.eup %2227 }
 0x339   :  { %v812_v61 = vmul.f32 %v2228_v56, %v811_v49  ;;  %v3012_v49 = vld [vmem:[#allocation10 + $0x138] sm:$0xff]  ;;  %v3020_v56 = vld [vmem:[#allocation10 + $0x120] sm:$0xff] }
 0x33b   :  { %v2912_v2 = vadd.f32 %v815_v60, %v812_v61  ;;  %v3024_v61 = vld [vmem:[#allocation10 + $0x110] sm:$0xff]  ;;  %v3028_v60 = vld [vmem:[#allocation10 + $0x108] sm:$0xff] }
 0x33d   :  { %817 = vst [vmem:[#allocation4] sm:$0x4] %v2912_v2  ;;  %v819_v58 = vrot.slane %v2912_v2, 2 }
 0x33f   :  { %886 = vmatmul.mubr.f32.vlgmr.msra.gmra.mxu0 %v819_v58  ;;  %2048 = vmatmul.mubr.f32.vlgmr.msra.gmra.mxu1 %v819_v58  ;;  %v3044_v58 = vld [vmem:[#allocation10 + $0xd8] sm:$0xff] }
 0x340   :  { %1000 = vmatpush1.msra.mxu0 %v2500_v7  ;;  %2051 = vmatpush3.msra.mxu1 %v2534_v20  ;;  %v3375_v7 = vld [vmem:[#allocation19_spill] sm:$0xff] }
 0x341   :  { %1001 = vmatprep.subr.mxu0 %v2502_v8  ;;  %2052 = vmatprep.subr.mxu1 %v3361_v57  ;;  %v3376_v8 = vld [vmem:[#allocation20_spill] sm:$0xff] }
 0x342   :  { %1002 = vmatpush1.msra.mxu0 %v2506_v9  ;;  %2053 = vmatpush3.msra.mxu1 %v2547_v24  ;;  %v3377_v9 = vld [vmem:[#allocation23_spill] sm:$0xff] }
 0x343   :  { %1003 = vmatprep.subr.mxu0 %v2509_v10  ;;  %2054 = vmatprep.subr.mxu1 %v3361_v57  ;;  %v3378_v10 = vld [vmem:[#allocation21_spill] sm:$0xff] }
 0x344   :  { %1004 = vmatpush1.msra.mxu0 %v2513_v11  ;;  %2055 = vmatpush3.msra.mxu1 %v2557_v27  ;;  %v3379_v11 = vld [vmem:[#allocation22_spill] sm:$0xff] }
 0x345   :  { %1005 = vmatprep.subr.mxu0 %v2516_v12  ;;  %2056 = vmatprep.subr.mxu1 %v3361_v57  ;;  %v3380_v12 = vld [vmem:[#allocation24_spill] sm:$0xff] }
 0x346   :  { %1006 = vmatpush1.msra.mxu0 %v2519_v13  ;;  %2057 = vmatpush3.msra.mxu1 %v2567_v30  ;;  %v3381_v13 = vld [vmem:[#allocation18_spill] sm:$0xff] }
 0x347   :  { %1007 = vmatprep.subr.mxu0 %v2522_v14  ;;  %2058 = vmatprep.subr.mxu1 %v3361_v57 }
 0x348   :  { %1008 = vmatpush1.msra.mxu0 %v2525_v16  ;;  %2059 = vmatpush3.msra.mxu1 %v2577_v33 }
 0x349   :  { %1009 = vmatprep.subr.mxu0 %v2528_v18  ;;  %2060 = vmatprep.subr.mxu1 %v3361_v57 }
 0x34a   :  { %1010 = vmatpush1.msra.mxu0 %v2532_v19  ;;  %2061 = vmatpush3.msra.mxu1 %v2587_v36 }
 0x34b   :  { %1011 = vmatprep.subr.mxu0 %v2540_v22  ;;  %2062 = vmatprep.subr.mxu1 %v3361_v57 }
 0x34c   :  { %1012 = vmatpush1.msra.mxu0 %v2544_v23  ;;  %2063 = vmatpush3.msra.mxu1 %v2597_v39 }
 0x34d   :  { %1013 = vmatprep.subr.mxu0 %v2550_v25  ;;  %2064 = vmatprep.subr.mxu1 %v3361_v57 }
 0x34e   :  { %1014 = vmatpush1.msra.mxu0 %v2554_v26  ;;  %2065 = vmatpush3.msra.mxu1 %v2607_v42 }
 0x34f   :  { %1015 = vmatprep.subr.mxu0 %v2560_v28  ;;  %2066 = vmatprep.subr.mxu1 %v3361_v57 }
 0x350   :  { %1016 = vmatpush1.msra.mxu0 %v2564_v29  ;;  %2067 = vmatpush3.msra.mxu1 %v2617_v45 }
 0x351   :  { %1017 = vmatprep.subr.mxu0 %v2570_v31  ;;  %2068 = vmatprep.subr.mxu1 %v3361_v57 }
 0x352   :  { %1018 = vmatpush1.msra.mxu0 %v2574_v32  ;;  %2069 = vmatpush3.msra.mxu1 %v2627_v48 }
 0x353   :  { %1019 = vmatprep.subr.mxu0 %v2580_v34  ;;  %2070 = vmatprep.subr.mxu1 %v3361_v57 }
 0x354   :  { %1020 = vmatpush1.msra.mxu0 %v2584_v35  ;;  %2071 = vmatpush3.msra.mxu1 %v2637_v51 }
 0x355   :  { %1021 = vmatprep.subr.mxu0 %v2590_v37  ;;  %2072 = vmatprep.subr.mxu1 %v3361_v57 }
 0x356   :  { %1022 = vmatpush1.msra.mxu0 %v2594_v38  ;;  %2073 = vmatpush3.msra.mxu1 %v2645_v53 }
 0x357   :  { %1023 = vmatprep.subr.mxu0 %v2600_v40  ;;  %2074 = vmatprep.subr.mxu1 %v3361_v57 }
 0x358   :  { %1024 = vmatpush1.msra.mxu0 %v2604_v41  ;;  %2075 = vmatpush3.msra.mxu1 %v2651_v54 }
 0x359   :  { %1025 = vmatprep.subr.mxu0 %v2610_v43  ;;  %2076 = vmatprep.subr.mxu1 %v3361_v57 }
 0x35a   :  { %1026 = vmatpush1.msra.mxu0 %v2614_v44  ;;  %2077 = vmatpush3.msra.mxu1 %v2657_v55  ;;  %v991_v44 = vrot.slane %v2912_v2, 7  ;;  %v3036_v2 = vld [vmem:[#allocation10 + $0xf0] sm:$0xff] }
 0x35b   :  { %1027 = vmatprep.subr.mxu0 %v3375_v7  ;;  %2078 = vmatprep.subr.mxu1 %v3361_v57 }
 0x35c   :  { %1028 = vmatpush1.msra.mxu0 %v3376_v8  ;;  %2079 = vmatpush3.msra.mxu1 %v3377_v9 }
 0x35d   :  { %1029 = vmatprep.subr.mxu0 %v3378_v10  ;;  %2080 = vmatprep.subr.mxu1 %v3361_v57 }
 0x35e   :  { %1030 = vmatpush1.msra.mxu0 %v3379_v11  ;;  %1063 = vmatprep.mubr.f32.mxu0 %v3361_v57 }
 0x35f   :  { %2081 = vmatpush3.msra.mxu1 %v3380_v12  ;;  %2082 = vmatprep.mubr.msk.f32.mxu1 %vm2442_vm0, %v3361_v57 }
 0x360   :  { %1177 = vmatprep.subr.mxu0 %v3381_v13  ;;  %2085 = vmatprep.subr.mxu1 %v3361_v57  ;;  %v3052_v13 = vld [vmem:[#allocation10 + $0xc0] sm:$0xff] }
 0x3ff   :  { %v887_v14 = vpop.f32.mrf.mxu0  ;;  %v958_v16 = vpop.f32.mrf.mxu1 }
 0x400   :  { %v963_v18 = vrot.slane %v887_v14, 5  ;;  %v982_v32 = vadd.f32 %v958_v16, %v2752_v3  ;;  %v3060_v14 = vld [vmem:[#allocation10 + $0xa8] sm:$0xff]  ;;  %v3068_v16 = vld [vmem:[#allocation10 + $0x90] sm:$0xff] }
 0x401   :  { %v889_v19 = vpop.f32.mrf.mxu0  ;;  %v2049_v20 = vpop.f32.mrf.mxu1 }
 0x402   :  { %v965_v22 = vadd.f32 %v963_v18, %v2743_v5  ;;  %v973_v24 = vrot.slane %v889_v19, 5  ;;  %v984_v35 = vrot.slane %v982_v32, 5  ;;  %v3076_v18 = vld [vmem:[#allocation10 + $0x78] sm:$0xff]  ;;  %v3084_v19 = vld [vmem:[#allocation10 + $0x60] sm:$0xff]  ;;  %v3092_v20 = vld [vmem:[#allocation10 + $0x48] sm:$0xff] }
 0x404   :  { %v1754_v23 = vmul.f32 -1.442695, %v965_v22  ;;  %v975_v25 = vadd.f32 %v973_v24, %v3367_v21  ;;  %v3100_v22 = vld [vmem:[#allocation10 + $0x30] sm:$0xff] }
 0x406   :  { %2229 = vpow2.f32 %v1754_v23  ;;  %v1755_v26 = vmul.f32 -1.442695, %v975_v25 }
 0x408   :  { %2231 = vpow2.f32 %v1755_v26 }
 0x413   :  { %v2230_v28 = vpop.eup %2229 }
 0x414   :  { %v969_v29 = vadd.f32 1.0, %v2230_v28 }
 0x415   :  { %v2232_v31 = vpop.eup %2231 }
 0x416   :  { %2233 = vrcp.f32 %v969_v29  ;;  %v979_v34 = vadd.f32 1.0, %v2232_v31 }
 0x418   :  { %2235 = vrcp.f32 %v979_v34 }
 0x423   :  { %v2234_v37 = vpop.eup %2233 }
 0x424   :  { %v986_v38 = vmul.f32 %v2234_v37, %v984_v35 }
 0x425   :  { %v2236_v41 = vpop.eup %2235 }
 0x426   :  { %v987_v40 = vadd.f32 %v986_v38, %v2755_v6  ;;  %v989_v43 = vsub.f32 1.0, %v2236_v41  ;;  %v993_v47 = vmul.f32 %v2236_v41, %v991_v44 }
 0x428   :  { %2237 = vtanh.f32 %v987_v40 }
 0x435   :  { %v2238_v1 = vpop.eup %2237 }
 0x436   :  { %v990_v46 = vmul.f32 %v2238_v1, %v989_v43 }
 0x438   :  { %v2988_v59 = vadd.f32 %v993_v47, %v990_v46 }
 0x43a   :  { %995 = vst [vmem:[#allocation4] sm:$0x8] %v2988_v59  ;;  %v997_v52 = vrot.slane %v2988_v59, 3  ;;  %v1169_v41 = vrot.slane %v2988_v59, 7  ;;  %v3137_v59 = vld [vmem:[#allocation10 + $0x148] sm:$0xff] }
 0x43c   :  { %1064 = vmatmul.mubr.f32.vlgmr.msra.gmra.mxu0 %v997_v52  ;;  %2083 = vmatmul.mubr.f32.vlgmr.msra.gmra.mxu1 %v997_v52  ;;  %v3143_v52 = vld [vmem:[#allocation10 + $0x130] sm:$0xff] }
 0x43d   :  { %1178 = vmatpush1.msra.mxu0 %v2992_v4  ;;  %2086 = vmatpush3.msra.mxu1 %v2995_v15 }
 0x43e   :  { %1179 = vmatprep.subr.mxu0 %v2998_v63  ;;  %2087 = vmatprep.subr.mxu1 %v3361_v57 }
 0x43f   :  { %1180 = vmatpush1.msra.mxu0 %v3002_v62  ;;  %2088 = vmatpush3.msra.mxu1 %v3005_v0 }
 0x440   :  { %1181 = vmatprep.subr.mxu0 %v3008_v17  ;;  %2089 = vmatprep.subr.mxu1 %v3361_v57 }
 0x441   :  { %1182 = vmatpush1.msra.mxu0 %v3012_v49  ;;  %2090 = vmatpush3.msra.mxu1 %v2557_v27  ;;  %v3032_v27 = vld [vmem:[#allocation10 + $0xf8] sm:$0xff] }
 0x442   :  { %1183 = vmatprep.subr.mxu0 %v3016_v50  ;;  %2091 = vmatprep.subr.mxu1 %v3361_v57 }
 0x443   :  { %1184 = vmatpush1.msra.mxu0 %v3020_v56  ;;  %2092 = vmatpush3.msra.mxu1 %v2567_v30  ;;  %v3040_v30 = vld [vmem:[#allocation10 + $0xe0] sm:$0xff] }
 0x444   :  { %1185 = vmatprep.subr.mxu0 %v3024_v61  ;;  %2093 = vmatprep.subr.mxu1 %v3361_v57 }
 0x445   :  { %1186 = vmatpush1.msra.mxu0 %v3028_v60  ;;  %2094 = vmatpush3.msra.mxu1 %v2577_v33  ;;  %v3048_v33 = vld [vmem:[#allocation10 + $0xc8] sm:$0xff] }
 0x446   :  { %1187 = vmatprep.subr.mxu0 %v3032_v27  ;;  %2095 = vmatprep.subr.mxu1 %v3361_v57 }
 0x447   :  { %1188 = vmatpush1.msra.mxu0 %v3036_v2  ;;  %2096 = vmatpush3.msra.mxu1 %v2587_v36  ;;  %v3056_v36 = vld [vmem:[#allocation10 + $0xb0] sm:$0xff] }
 0x448   :  { %1189 = vmatprep.subr.mxu0 %v3040_v30  ;;  %2097 = vmatprep.subr.mxu1 %v3361_v57 }
 0x449   :  { %1190 = vmatpush1.msra.mxu0 %v3044_v58  ;;  %2098 = vmatpush3.msra.mxu1 %v2597_v39  ;;  %v3064_v39 = vld [vmem:[#allocation10 + $0x98] sm:$0xff] }
 0x44a   :  { %1191 = vmatprep.subr.mxu0 %v3048_v33  ;;  %2099 = vmatprep.subr.mxu1 %v3361_v57 }
 0x44b   :  { %1192 = vmatpush1.msra.mxu0 %v3052_v13  ;;  %2100 = vmatpush3.msra.mxu1 %v2607_v42  ;;  %v3072_v42 = vld [vmem:[#allocation10 + $0x80] sm:$0xff] }
 0x44c   :  { %1193 = vmatprep.subr.mxu0 %v3056_v36  ;;  %2101 = vmatprep.subr.mxu1 %v3361_v57 }
 0x44d   :  { %1194 = vmatpush1.msra.mxu0 %v3060_v14  ;;  %2102 = vmatpush3.msra.mxu1 %v2617_v45  ;;  %v3080_v45 = vld [vmem:[#allocation10 + $0x68] sm:$0xff] }
 0x44e   :  { %1195 = vmatprep.subr.mxu0 %v3064_v39  ;;  %2103 = vmatprep.subr.mxu1 %v3361_v57 }
 0x44f   :  { %1196 = vmatpush1.msra.mxu0 %v3068_v16  ;;  %2104 = vmatpush3.msra.mxu1 %v2627_v48  ;;  %v3088_v48 = vld [vmem:[#allocation10 + $0x50] sm:$0xff] }
 0x450   :  { %1197 = vmatprep.subr.mxu0 %v3072_v42  ;;  %2105 = vmatprep.subr.mxu1 %v3361_v57 }
 0x451   :  { %1198 = vmatpush1.msra.mxu0 %v3076_v18  ;;  %2106 = vmatpush3.msra.mxu1 %v2637_v51  ;;  %v3096_v51 = vld [vmem:[#allocation10 + $0x38] sm:$0xff] }
 0x452   :  { %1199 = vmatprep.subr.mxu0 %v3080_v45  ;;  %2107 = vmatprep.subr.mxu1 %v3361_v57 }
 0x453   :  { %1200 = vmatpush1.msra.mxu0 %v3084_v19  ;;  %2108 = vmatpush3.msra.mxu1 %v2645_v53  ;;  %v3115_v53 = vld [vmem:[#allocation10 + $0x170] sm:$0xff] }
 0x454   :  { %1201 = vmatprep.subr.mxu0 %v3088_v48  ;;  %2109 = vmatprep.subr.mxu1 %v3361_v57 }
 0x455   :  { %1202 = vmatpush1.msra.mxu0 %v3092_v20  ;;  %2110 = vmatpush3.msra.mxu1 %v2651_v54 }
 0x456   :  { %1203 = vmatprep.subr.mxu0 %v3096_v51  ;;  %2111 = vmatprep.subr.mxu1 %v3361_v57 }
 0x457   :  { %1204 = vmatpush1.msra.mxu0 %v3100_v22  ;;  %2112 = vmatpush3.msra.mxu1 %v2657_v55 }
 0x458   :  { %1205 = vmatprep.subr.mxu0 %v3375_v7  ;;  %2113 = vmatprep.subr.mxu1 %v3361_v57 }
 0x459   :  { %1206 = vmatpush1.msra.mxu0 %v3376_v8  ;;  %2114 = vmatpush3.msra.mxu1 %v3377_v9 }
 0x45a   :  { %1207 = vmatprep.subr.mxu0 %v3378_v10  ;;  %2115 = vmatprep.subr.mxu1 %v3361_v57 }
 0x45b   :  { %1208 = vmatpush1.msra.mxu0 %v3379_v11  ;;  %1241 = vmatprep.mubr.f32.mxu0 %v3361_v57 }
 0x45c   :  { %2116 = vmatpush3.msra.mxu1 %v3380_v12  ;;  %2117 = vmatprep.mubr.msk.f32.mxu1 %vm2442_vm0, %v3361_v57 }
 0x45d   :  { %1355 = vmatprep.subr.mxu0 %v3115_v53  ;;  %2120 = vmatprep.subr.mxu1 %v3361_v57 }
 0x4fc   :  { %v1065_v54 = vpop.f32.mrf.mxu0  ;;  %v1136_v55 = vpop.f32.mrf.mxu1 }
 0x4fd   :  { %v1141_v7 = vrot.slane %v1065_v54, 4  ;;  %v1160_v29 = vadd.f32 %v1136_v55, %v2752_v3  ;;  %v3149_v54 = vld [vmem:[#allocation10 + $0x118] sm:$0xff]  ;;  %v3155_v55 = vld [vmem:[#allocation10 + $0x100] sm:$0xff] }
 0x4fe   :  { %v1067_v8 = vpop.f32.mrf.mxu0  ;;  %v2084_v9 = vpop.f32.mrf.mxu1 }
 0x4ff   :  { %v1143_v10 = vadd.f32 %v1141_v7, %v2743_v5  ;;  %v1151_v23 = vrot.slane %v1067_v8, 4  ;;  %v1162_v32 = vrot.slane %v1160_v29, 4  ;;  %v3161_v7 = vld [vmem:[#allocation10 + $0xe8] sm:$0xff]  ;;  %v3167_v8 = vld [vmem:[#allocation10 + $0xd0] sm:$0xff]  ;;  %v3173_v9 = vld [vmem:[#allocation10 + $0xb8] sm:$0xff] }
 0x500   :  { %v3216_v29 = vld [vmem:[#allocation10 + $0x8] sm:$0xff] }
 0x501   :  { %v1756_v11 = vmul.f32 -1.442695, %v1143_v10  ;;  %v1153_v12 = vadd.f32 %v1151_v23, %v3367_v21  ;;  %v3179_v10 = vld [vmem:[#allocation10 + $0xa0] sm:$0xff]  ;;  %v3191_v23 = vld [vmem:[#allocation10 + $0x70] sm:$0xff]  ;;  %3385 = vst [vmem:[#allocation23_spill] sm:$0xff] %v3216_v29 }
 0x503   :  { %2239 = vpow2.f32 %v1756_v11  ;;  %v1757_v24 = vmul.f32 -1.442695, %v1153_v12  ;;  %v3185_v11 = vld [vmem:[#allocation10 + $0x88] sm:$0xff]  ;;  %v3197_v12 = vld [vmem:[#allocation10 + $0x58] sm:$0xff] }
 0x505   :  { %2241 = vpow2.f32 %v1757_v24  ;;  %v3203_v24 = vld [vmem:[#allocation10 + $0x40] sm:$0xff] }
 0x510   :  { %v2240_v25 = vpop.eup %2239 }
 0x511   :  { %v1147_v26 = vadd.f32 1.0, %v2240_v25  ;;  %v3206_v25 = vld [vmem:[#allocation10 + $0x20] sm:$0xff] }
 0x512   :  { %v2242_v28 = vpop.eup %2241  ;;  %3382 = vst [vmem:[#allocation25_spill] sm:$0xff] %v3206_v25 }
 0x513   :  { %2243 = vrcp.f32 %v1147_v26  ;;  %v1157_v31 = vadd.f32 1.0, %v2242_v28  ;;  %v3210_v26 = vld [vmem:[#allocation10 + $0x18] sm:$0xff]  ;;  %v3213_v28 = vld [vmem:[#allocation10 + $0x28] sm:$0xff] }
 0x514   :  { %3383 = vst [vmem:[#allocation19_spill] sm:$0xff] %v3210_v26  ;;  %3384 = vst [vmem:[#allocation20_spill] sm:$0xff] %v3213_v28 }
 0x515   :  { %2245 = vrcp.f32 %v1157_v31  ;;  %v3220_v31 = vld [vmem:[#allocation10] sm:$0xff] }
 0x516   :  { %3386 = vst [vmem:[#allocation21_spill] sm:$0xff] %v3220_v31 }
 0x520   :  { %v2244_v34 = vpop.eup %2243 }
 0x521   :  { %v1164_v35 = vmul.f32 %v2244_v34, %v1162_v32  ;;  %v3224_v32 = vld [vmem:[#allocation10 + $0x10] sm:$0xff] }
 0x522   :  { %v2246_v38 = vpop.eup %2245  ;;  %3387 = vst [vmem:[#allocation22_spill] sm:$0xff] %v3224_v32 }
 0x523   :  { %v1165_v37 = vadd.f32 %v1164_v35, %v2755_v6  ;;  %v1167_v40 = vsub.f32 1.0, %v2246_v38  ;;  %v1171_v1 = vmul.f32 %v2246_v38, %v1169_v41 }
 0x525   :  { %2247 = vtanh.f32 %v1165_v37 }
 0x532   :  { %v2248_v43 = vpop.eup %2247 }
 0x533   :  { %v1168_v44 = vmul.f32 %v2248_v43, %v1167_v40 }
 0x535   :  { %v3124_v46 = vadd.f32 %v1171_v1, %v1168_v44 }
 0x537   :  { %1173 = vst [vmem:[#allocation4] sm:$0x10] %v3124_v46  ;;  %v1175_v47 = vrot.slane %v3124_v46, 4 }
 0x539   :  { %1242 = vmatmul.mubr.f32.vlgmr.msra.gmra.mxu0 %v1175_v47  ;;  %2118 = vmatmul.mubr.f32.vlgmr.msra.gmra.mxu1 %v1175_v47 }
 0x53a   :  { %1356 = vmatpush1.msra.mxu0 %v2992_v4  ;;  %2121 = vmatpush3.msra.mxu1 %v2995_v15 }
 0x53b   :  { %1357 = vmatprep.subr.mxu0 %v2998_v63  ;;  %2122 = vmatprep.subr.mxu1 %v3361_v57 }
 0x53c   :  { %1358 = vmatpush1.msra.mxu0 %v3002_v62  ;;  %2123 = vmatpush3.msra.mxu1 %v3005_v0 }
 0x53d   :  { %1359 = vmatprep.subr.mxu0 %v3008_v17  ;;  %2124 = vmatprep.subr.mxu1 %v3361_v57 }
 0x53e   :  { %1360 = vmatpush1.msra.mxu0 %v3012_v49  ;;  %2125 = vmatpush3.msra.mxu1 %v3137_v59 }
 0x53f   :  { %1361 = vmatprep.subr.mxu0 %v3016_v50  ;;  %2126 = vmatprep.subr.mxu1 %v3361_v57 }
 0x540   :  { %1362 = vmatpush1.msra.mxu0 %v3020_v56  ;;  %2127 = vmatpush3.msra.mxu1 %v3143_v52 }
 0x541   :  { %1363 = vmatprep.subr.mxu0 %v3024_v61  ;;  %2128 = vmatprep.subr.mxu1 %v3361_v57 }
 0x542   :  { %1364 = vmatpush1.msra.mxu0 %v3028_v60  ;;  %2129 = vmatpush3.msra.mxu1 %v3149_v54 }
 0x543   :  { %1365 = vmatprep.subr.mxu0 %v3032_v27  ;;  %2130 = vmatprep.subr.mxu1 %v3361_v57 }
 0x544   :  { %1366 = vmatpush1.msra.mxu0 %v3036_v2  ;;  %2131 = vmatpush3.msra.mxu1 %v3155_v55 }
 0x545   :  { %1367 = vmatprep.subr.mxu0 %v3040_v30  ;;  %2132 = vmatprep.subr.mxu1 %v3361_v57 }
 0x546   :  { %1368 = vmatpush1.msra.mxu0 %v3044_v58  ;;  %2133 = vmatpush3.msra.mxu1 %v3161_v7 }
 0x547   :  { %1369 = vmatprep.subr.mxu0 %v3048_v33  ;;  %2134 = vmatprep.subr.mxu1 %v3361_v57 }
 0x548   :  { %1370 = vmatpush1.msra.mxu0 %v3052_v13  ;;  %2135 = vmatpush3.msra.mxu1 %v3167_v8 }
 0x549   :  { %1371 = vmatprep.subr.mxu0 %v3056_v36  ;;  %2136 = vmatprep.subr.mxu1 %v3361_v57 }
 0x54a   :  { %1372 = vmatpush1.msra.mxu0 %v3060_v14  ;;  %2137 = vmatpush3.msra.mxu1 %v3173_v9 }
 0x54b   :  { %1373 = vmatprep.subr.mxu0 %v3064_v39  ;;  %2138 = vmatprep.subr.mxu1 %v3361_v57 }
 0x54c   :  { %1374 = vmatpush1.msra.mxu0 %v3068_v16  ;;  %2139 = vmatpush3.msra.mxu1 %v3179_v10 }
 0x54d   :  { %1375 = vmatprep.subr.mxu0 %v3072_v42  ;;  %2140 = vmatprep.subr.mxu1 %v3361_v57 }
 0x54e   :  { %1376 = vmatpush1.msra.mxu0 %v3076_v18  ;;  %2141 = vmatpush3.msra.mxu1 %v3185_v11 }
 0x54f   :  { %1377 = vmatprep.subr.mxu0 %v3080_v45  ;;  %2142 = vmatprep.subr.mxu1 %v3361_v57 }
 0x550   :  { %1378 = vmatpush1.msra.mxu0 %v3084_v19  ;;  %2143 = vmatpush3.msra.mxu1 %v3191_v23 }
 0x551   :  { %1379 = vmatprep.subr.mxu0 %v3088_v48  ;;  %2144 = vmatprep.subr.mxu1 %v3361_v57 }
 0x552   :  { %1380 = vmatpush1.msra.mxu0 %v3092_v20  ;;  %2145 = vmatpush3.msra.mxu1 %v3197_v12 }
 0x553   :  { %1381 = vmatprep.subr.mxu0 %v3096_v51  ;;  %2146 = vmatprep.subr.mxu1 %v3361_v57 }
 0x554   :  { %1382 = vmatpush1.msra.mxu0 %v3100_v22  ;;  %2147 = vmatpush3.msra.mxu1 %v3203_v24 }
 0x555   :  { %1383 = vmatprep.subr.mxu0 %v3206_v25  ;;  %2148 = vmatprep.subr.mxu1 %v3361_v57 }
 0x556   :  { %1384 = vmatpush1.msra.mxu0 %v3210_v26  ;;  %2149 = vmatpush3.msra.mxu1 %v3213_v28 }
 0x557   :  { %1385 = vmatprep.subr.mxu0 %v3216_v29  ;;  %2150 = vmatprep.subr.mxu1 %v3361_v57 }
 0x558   :  { %1386 = vmatpush1.msra.mxu0 %v3220_v31  ;;  %1419 = vmatprep.mubr.f32.mxu0 %v3361_v57 }
 0x559   :  { %2151 = vmatpush3.msra.mxu1 %v3224_v32  ;;  %2152 = vmatprep.mubr.msk.f32.mxu1 %vm2442_vm0, %v3361_v57 }
 0x55a   :  { %1533 = vmatprep.subr.mxu0 %v3115_v53  ;;  %2155 = vmatprep.subr.mxu1 %v3361_v57 }
 0x5f9   :  { %v1243_v34 = vpop.f32.mrf.mxu0  ;;  %v1314_v35 = vpop.f32.mrf.mxu1 }
 0x5fa   :  { %v1319_v37 = vrot.slane %v1243_v34, 3  ;;  %v1338_v29 = vadd.f32 %v1314_v35, %v2752_v3 }
 0x5fb   :  { %v1245_v38 = vpop.f32.mrf.mxu0  ;;  %v2119_v40 = vpop.f32.mrf.mxu1 }
 0x5fc   :  { %v1321_v41 = vadd.f32 %v1319_v37, %v2743_v5  ;;  %v1329_v44 = vrot.slane %v1245_v38, 3  ;;  %v1340_v26 = vrot.slane %v1338_v29, 3 }
 0x5fe   :  { %v1758_v43 = vmul.f32 -1.442695, %v1321_v41  ;;  %v1331_v1 = vadd.f32 %v1329_v44, %v3367_v21  ;;  %v1347_v41 = vrot.slane %v3124_v46, 7 }
 0x600   :  { %2249 = vpow2.f32 %v1758_v43  ;;  %v1759_v47 = vmul.f32 -1.442695, %v1331_v1 }
 0x602   :  { %2251 = vpow2.f32 %v1759_v47 }
 0x60d   :  { %v2250_v32 = vpop.eup %2249 }
 0x60e   :  { %v1325_v31 = vadd.f32 1.0, %v2250_v32 }
 0x60f   :  { %v2252_v53 = vpop.eup %2251 }
 0x610   :  { %2253 = vrcp.f32 %v1325_v31  ;;  %v1335_v28 = vadd.f32 1.0, %v2252_v53 }
 0x612   :  { %2255 = vrcp.f32 %v1335_v28 }
 0x61d   :  { %v2254_v34 = vpop.eup %2253 }
 0x61e   :  { %v1342_v25 = vmul.f32 %v2254_v34, %v1340_v26 }
 0x61f   :  { %v2256_v38 = vpop.eup %2255 }
 0x620   :  { %v1343_v37 = vadd.f32 %v1342_v25, %v2755_v6  ;;  %v1345_v40 = vsub.f32 1.0, %v2256_v38  ;;  %v1349_v1 = vmul.f32 %v2256_v38, %v1347_v41 }
 0x622   :  { %2257 = vtanh.f32 %v1343_v37 }
 0x62f   :  { %v2258_v43 = vpop.eup %2257 }
 0x630   :  { %v1346_v44 = vmul.f32 %v2258_v43, %v1345_v40 }
 0x632   :  { %v3236_v32 = vadd.f32 %v1349_v1, %v1346_v44 }
 0x634   :  { %1351 = vst [vmem:[#allocation4] sm:$0x20] %v3236_v32  ;;  %v1353_v3 = vrot.slane %v3236_v32, 5 }
 0x636   :  { %1420 = vmatmul.mubr.f32.vlgmr.msra.gmra.mxu0 %v1353_v3  ;;  %2153 = vmatmul.mubr.f32.vlgmr.msra.gmra.mxu1 %v1353_v3 }
 0x637   :  { %1534 = vmatpush1.msra.mxu0 %v2992_v4  ;;  %2156 = vmatpush3.msra.mxu1 %v2995_v15  ;;  %v3388_v4 = vld [vmem:[#allocation25_spill] sm:$0xff]  ;;  %v3389_v15 = vld [vmem:[#allocation19_spill] sm:$0xff] }
 0x638   :  { %1535 = vmatprep.subr.mxu0 %v2998_v63  ;;  %2157 = vmatprep.subr.mxu1 %v3361_v57  ;;  %v3390_v63 = vld [vmem:[#allocation20_spill] sm:$0xff] }
 0x639   :  { %1536 = vmatpush1.msra.mxu0 %v3002_v62  ;;  %2158 = vmatpush3.msra.mxu1 %v3005_v0  ;;  %v3391_v62 = vld [vmem:[#allocation23_spill] sm:$0xff]  ;;  %v3392_v0 = vld [vmem:[#allocation21_spill] sm:$0xff] }
 0x63a   :  { %1537 = vmatprep.subr.mxu0 %v3008_v17  ;;  %2159 = vmatprep.subr.mxu1 %v3361_v57  ;;  %v3393_v17 = vld [vmem:[#allocation22_spill] sm:$0xff] }
 0x63b   :  { %1538 = vmatpush1.msra.mxu0 %v3012_v49  ;;  %2160 = vmatpush3.msra.mxu1 %v3137_v59 }
 0x63c   :  { %1539 = vmatprep.subr.mxu0 %v3016_v50  ;;  %2161 = vmatprep.subr.mxu1 %v3361_v57 }
 0x63d   :  { %1540 = vmatpush1.msra.mxu0 %v3020_v56  ;;  %2162 = vmatpush3.msra.mxu1 %v3143_v52 }
 0x63e   :  { %1541 = vmatprep.subr.mxu0 %v3024_v61  ;;  %2163 = vmatprep.subr.mxu1 %v3361_v57 }
 0x63f   :  { %1542 = vmatpush1.msra.mxu0 %v3028_v60  ;;  %2164 = vmatpush3.msra.mxu1 %v3149_v54 }
 0x640   :  { %1543 = vmatprep.subr.mxu0 %v3032_v27  ;;  %2165 = vmatprep.subr.mxu1 %v3361_v57 }
 0x641   :  { %1544 = vmatpush1.msra.mxu0 %v3036_v2  ;;  %2166 = vmatpush3.msra.mxu1 %v3155_v55 }
 0x642   :  { %1545 = vmatprep.subr.mxu0 %v3040_v30  ;;  %2167 = vmatprep.subr.mxu1 %v3361_v57 }
 0x643   :  { %1546 = vmatpush1.msra.mxu0 %v3044_v58  ;;  %2168 = vmatpush3.msra.mxu1 %v3161_v7 }
 0x644   :  { %1547 = vmatprep.subr.mxu0 %v3048_v33  ;;  %2169 = vmatprep.subr.mxu1 %v3361_v57 }
 0x645   :  { %1548 = vmatpush1.msra.mxu0 %v3052_v13  ;;  %2170 = vmatpush3.msra.mxu1 %v3167_v8 }
 0x646   :  { %1549 = vmatprep.subr.mxu0 %v3056_v36  ;;  %2171 = vmatprep.subr.mxu1 %v3361_v57 }
 0x647   :  { %1550 = vmatpush1.msra.mxu0 %v3060_v14  ;;  %2172 = vmatpush3.msra.mxu1 %v3173_v9 }
 0x648   :  { %1551 = vmatprep.subr.mxu0 %v3064_v39  ;;  %2173 = vmatprep.subr.mxu1 %v3361_v57 }
 0x649   :  { %1552 = vmatpush1.msra.mxu0 %v3068_v16  ;;  %2174 = vmatpush3.msra.mxu1 %v3179_v10 }
 0x64a   :  { %1553 = vmatprep.subr.mxu0 %v3072_v42  ;;  %2175 = vmatprep.subr.mxu1 %v3361_v57 }
 0x64b   :  { %1554 = vmatpush1.msra.mxu0 %v3076_v18  ;;  %2176 = vmatpush3.msra.mxu1 %v3185_v11 }
 0x64c   :  { %1555 = vmatprep.subr.mxu0 %v3080_v45  ;;  %2177 = vmatprep.subr.mxu1 %v3361_v57 }
 0x64d   :  { %1556 = vmatpush1.msra.mxu0 %v3084_v19  ;;  %2178 = vmatpush3.msra.mxu1 %v3191_v23 }
 0x64e   :  { %1557 = vmatprep.subr.mxu0 %v3088_v48  ;;  %2179 = vmatprep.subr.mxu1 %v3361_v57 }
 0x64f   :  { %1558 = vmatpush1.msra.mxu0 %v3092_v20  ;;  %2180 = vmatpush3.msra.mxu1 %v3197_v12 }
 0x650   :  { %1559 = vmatprep.subr.mxu0 %v3096_v51  ;;  %2181 = vmatprep.subr.mxu1 %v3361_v57  ;;  %v1525_v51 = vrot.slane %v3236_v32, 7 }
 0x651   :  { %1560 = vmatpush1.msra.mxu0 %v3100_v22  ;;  %2182 = vmatpush3.msra.mxu1 %v3203_v24 }
 0x652   :  { %1561 = vmatprep.subr.mxu0 %v3388_v4  ;;  %2183 = vmatprep.subr.mxu1 %v3361_v57 }
 0x653   :  { %1562 = vmatpush1.msra.mxu0 %v3389_v15  ;;  %2184 = vmatpush3.msra.mxu1 %v3390_v63 }
 0x654   :  { %1563 = vmatprep.subr.mxu0 %v3391_v62  ;;  %2185 = vmatprep.subr.mxu1 %v3361_v57 }
 0x655   :  { %1564 = vmatpush1.msra.mxu0 %v3392_v0  ;;  %1597 = vmatprep.mubr.f32.mxu0 %v3361_v57 }
 0x656   :  { %2186 = vmatpush3.msra.mxu1 %v3393_v17  ;;  %2187 = vmatprep.mubr.msk.f32.mxu1 %vm2442_vm0, %v3361_v57  ;;  %v2327_v57 = vld [vmem:[%s3325_s4] sm:$0x1]  ;;  %s2443_s4 = smov [#allocation11]  }
 0x657   :  { %s1722_s21 = sshll.u32 %s2443_s4, 4  ;;  %s1723_s21 = int_to_ptr.vmem [resolvable:$true] %s1722_s21 }
 0x658   :  { %s2388_s22 = scalar_lea.vmem %s1723_s21, 128  ;;  %p2393_p2 = scmp.lt.s32.totalorder %s1723_s21, %s1723_s21 }
 0x659   :  { %p2389_p1 = scmp.ne.s32.totalorder %s1723_s21, %s2388_s22  ;;  %p2394_p3 = scmp.lt.s32.totalorder %s2388_s22, %s2388_s22 }
 0x65b   :  { %p2395_p4 = por %p2394_p3, %p2393_p2 }
 0x65d   :  { %p2396_p5 = pnand %p2395_p4, %p2389_p1 }
 0x6f6   :  { %v1421_v49 = vpop.f32.mrf.mxu0  ;;  %v1492_v50 = vpop.f32.mrf.mxu1 }
 0x6f7   :  { %v1497_v56 = vrot.slane %v1421_v49, 2  ;;  %v1516_v39 = vadd.f32 %v2327_v57, %v1492_v50 }
 0x6f8   :  { %v1423_v61 = vpop.f32.mrf.mxu0  ;;  %v2154_v60 = vpop.f32.mrf.mxu1 }
 0x6f9   :  { %v1499_v27 = vadd.f32 %v1497_v56, %v2743_v5  ;;  %v1507_v30 = vrot.slane %v1423_v61, 2  ;;  %v1518_v42 = vrot.slane %v1516_v39, 2 }
 0x6fb   :  { %v1760_v2 = vmul.f32 -1.442695, %v1499_v27  ;;  %v1509_v58 = vadd.f32 %v1507_v30, %v3367_v21 }
 0x6fd   :  { %2259 = vpow2.f32 %v1760_v2  ;;  %v1761_v33 = vmul.f32 -1.442695, %v1509_v58 }
 0x6ff   :  { %2261 = vpow2.f32 %v1761_v33 }
 0x70a   :  { %v2260_v13 = vpop.eup %2259 }
 0x70b   :  { %v1503_v36 = vadd.f32 1.0, %v2260_v13 }
 0x70c   :  { %v2262_v14 = vpop.eup %2261 }
 0x70d   :  { %2263 = vrcp.f32 %v1503_v36  ;;  %v1513_v16 = vadd.f32 1.0, %v2262_v14 }
 0x70f   :  { %2265 = vrcp.f32 %v1513_v16 }
 0x71a   :  { %v2264_v18 = vpop.eup %2263 }
 0x71b   :  { %v1520_v45 = vmul.f32 %v2264_v18, %v1518_v42 }
 0x71c   :  { %v2266_v48 = vpop.eup %2265 }
 0x71d   :  { %v1521_v19 = vadd.f32 %v1520_v45, %v2755_v6  ;;  %v1523_v20 = vsub.f32 1.0, %v2266_v48  ;;  %v1527_v59 = vmul.f32 %v2266_v48, %v1525_v51 }
 0x71f   :  { %2267 = vtanh.f32 %v1521_v19 }
 0x72c   :  { %v2268_v22 = vpop.eup %2267 }
 0x72d   :  { %v1524_v46 = vmul.f32 %v2268_v22, %v1523_v20 }
 0x72f   :  { %v1528_v52 = vadd.f32 %v1527_v59, %v1524_v46 }
 0x731   :  { %1529 = vst [vmem:[#allocation4] sm:$0x40] %v1528_v52  ;;  %v1531_v54 = vrot.slane %v1528_v52, 6  ;;  %v1703_v38 = vrot.slane %v1528_v52, 7 }
 0x733   :  { %1598 = vmatmul.mubr.f32.vlgmr.msra.gmra.mxu0 %v1531_v54  ;;  %2188 = vmatmul.mubr.f32.vlgmr.msra.gmra.mxu1 %v1531_v54 }
 0x7f3   :  { %v1599_v55 = vpop.f32.mrf.mxu0  ;;  %v1670_v7 = vpop.f32.mrf.mxu1 }
 0x7f4   :  { %v1675_v8 = vrot.slane %v1599_v55, 1  ;;  %v1694_v31 = vadd.f32 %v2327_v57, %v1670_v7 }
 0x7f5   :  { %v1601_v9 = vpop.f32.mrf.mxu0  ;;  %v2189_v10 = vpop.f32.mrf.mxu1 }
 0x7f6   :  { %v1677_v11 = vadd.f32 %v1675_v8, %v2743_v5  ;;  %v1685_v12 = vrot.slane %v1601_v9, 1  ;;  %v1696_v47 = vrot.slane %v1694_v31, 1 }
 0x7f8   :  { %v1762_v23 = vmul.f32 -1.442695, %v1677_v11  ;;  %v1687_v24 = vadd.f32 %v1685_v12, %v3367_v21 }
 0x7fa   :  { %2269 = vpow2.f32 %v1762_v23  ;;  %v1763_v25 = vmul.f32 -1.442695, %v1687_v24 }
 0x7fc   :  { %2271 = vpow2.f32 %v1763_v25 }
 0x807   :  { %v2270_v26 = vpop.eup %2269 }
 0x808   :  { %v1681_v28 = vadd.f32 1.0, %v2270_v26 }
 0x809   :  { %v2272_v29 = vpop.eup %2271 }
 0x80a   :  { %2273 = vrcp.f32 %v1681_v28  ;;  %v1691_v35 = vadd.f32 1.0, %v2272_v29 }
 0x80c   :  { %2275 = vrcp.f32 %v1691_v35 }
 0x817   :  { %v2274_v53 = vpop.eup %2273 }
 0x818   :  { %v1698_v34 = vmul.f32 %v2274_v53, %v1696_v47 }
 0x819   :  { %v2276_v5 = vpop.eup %2275 }
 0x81a   :  { %v1699_v37 = vadd.f32 %v1698_v34, %v2755_v6  ;;  %v1701_v40 = vsub.f32 1.0, %v2276_v5  ;;  %v1705_v43 = vmul.f32 %v2276_v5, %v1703_v38 }
 0x81c   :  { %2277 = vtanh.f32 %v1699_v37 }
 0x829   :  { %v2278_v41 = vpop.eup %2277 }
 0x82a   :  { %v1702_v21 = vmul.f32 %v2278_v41, %v1701_v40 }
 0x82c   :  { %v1706_v44 = vadd.f32 %v1705_v43, %v1702_v21 }
 0x82e   :  { %1707 = vst [vmem:[#allocation4] sm:$0x80] %v1706_v44  ;;  %1710 = vst [vmem:[#allocation2 - $0x7] sm:$0x80] %v1706_v44 }
 0x835   :  { %v1708_v1 = vld [vmem:[#allocation4] sm:$0xff] }
 0x836   :  { %1709 = vst [vmem:[#allocation11] sm:$0xff] %v1708_v1 }
 0x837   :  { %2399 = shalt.err (!%p2396_p5)
}
 0x838   :  { %1725 = dma.vmem_to_hbm [thread:$0]  %s1723_s21, 128, %s3327_s6, [#allocation7]  }
 0x839   :  { %s2444_s25 = smov [#allocation12]  }
 0x83a   :  { %s1732_s26 = sshll.u32 %s2444_s25, 4  ;;  %s1733_s26 = int_to_ptr.vmem [resolvable:$true] %s1732_s26 }
 0x83b   :  { %s2408_s27 = scalar_lea.vmem %s1733_s26, 16  ;;  %s2412_s28 = scalar_lea.vmem %s1733_s26, 32 }
 0x83c   :  { %p2409_p6 = scmp.ne.s32.totalorder %s1733_s26, %s2408_s27  ;;  %p2413_p7 = scmp.lt.s32.totalorder %s1733_s26, %s1733_s26 }
 0x83d   :  { %v1714_v6 = vld [vmem:[#allocation11 + $0x7] sm:$0x1]  ;;  %p2414_p8 = scmp.lt.s32.totalorder %s2412_s28, %s2408_s27 }
 0x83e   :  { %1715 = vst [vmem:[#allocation12] sm:$0x1] %v1714_v6 }
 0x83f   :  { %p2415_p9 = por %p2414_p8, %p2413_p7 }
 0x841   :  { %p2416_p10 = pnand %p2415_p9, %p2409_p6 }
 0x843   :  { %2419 = shalt.err (!%p2416_p10)
}
 0x844   :  { %1735 = dma.vmem_to_hbm [thread:$0]  %s1733_s26, 16, %s3328_s7, [#allocation13]  }
 0x845   :  { %2432 = dma.done.wait [#allocation7], 128  }
 0x846   :  { %2433 = vsyncadd [#allocation7], 4294967168 }
 0x847   :  { %2434 = dma.done.wait [#allocation13], 16  }
 0x848   :  { %2435 = vsyncadd [#allocation13], 4294967280 }
 0x849   :  { %1742 = vsyncpa [#allocation6], 1 }
 0x84a   :  { %1743 = vsyncpa [#allocation9], 1 }
 0x84b   :  { %1744 = vsyncpa [#allocation7], 1 }
 0x84c   :  { %1745 = vsyncpa [#allocation13], 1 }

</bundles_post_ra>
